<compile_context>
chip_gen: v7x
topology: tpu7x:2x2x1
jax: 0.10.0
libtpu: 0.0.40
codegen_flags: <defaults>
</compile_context>

<pallas_src>
import jax
import jax.numpy as jnp
from jax import lax
from jax.experimental import pallas as pl
from jax.experimental.pallas import tpu as pltpu


def _round_up(x, m):
    return ((x + m - 1) // m) * m


def _pad2d(x, rows, cols, dtype):
    out = jnp.zeros((rows, cols), dtype)
    return out.at[: x.shape[0], : x.shape[1]].set(x.astype(dtype))


def _pad_gate_cols(w, rows, H, Hp, dtype):
    """(r, 4H) -> (rows, 4Hp); gate g's columns re-placed at [g*Hp, g*Hp + H)."""
    out = jnp.zeros((rows, 4 * Hp), dtype)
    for g in range(4):
        out = out.at[: w.shape[0], g * Hp: g * Hp + H].set(
            w[:, g * H:(g + 1) * H].astype(dtype))
    return out


# ----------------------------------------------------------------------------
# Fused VQAnet kernel (one batch block per grid step)
# ----------------------------------------------------------------------------
def vqanet_kernel(gap_ref, emb_ref, len_ref,
                  wimg_ref, bimg_ref,
                  wih_ref, whh_ref, blstm_ref,
                  w1i_ref, w1q_ref, b1_ref,
                  w2_ref, b2_ref,
                  out_ref,
                  gx_ref):
    T, Bt, H4 = gx_ref.shape
    H = H4 // 4

    # --- 1. Image branch: linear projection of the (Bt, C) GAP features
    #        (stand-in for the frozen resnet152 head). ---
    img_act = (jnp.dot(gap_ref[...], wimg_ref[...],
                       preferred_element_type=jnp.float32)
               + bimg_ref[...])                              # (Bt, R) f32

    # --- 2. Hoisted input-side gate pre-activations, staged per timestep into a
    #        single lane-aligned (T, Bt, 4H) scratch (keeps live values small). ---
    wih = wih_ref[...]
    b_lstm = jnp.broadcast_to(blstm_ref[...], (Bt, H4))      # hoisted broadcast

    def stage(t, carry):
        gx_ref[t] = (jnp.dot(emb_ref[t], wih,
                             preferred_element_type=jnp.float32) + b_lstm)
        return carry

    lax.fori_loop(0, T, stage, 0)

    # --- 3. Recurrence: one fused (Bt,H)@(H,4H) matmul per step; gate slices are
    #        lane-aligned (H is a multiple of 128). ---
    whh = whh_ref[...]
    len_col = len_ref[...]                                   # (Bt, 1) int32

    def sig(x):  # sigmoid via tanh: 1 EUP push instead of exp + reciprocal
        return 0.5 * (jnp.tanh(0.5 * x) + 1.0)

    def step(t, carry):
        h, c = carry
        gates = gx_ref[t] + jnp.dot(h.astype(whh.dtype), whh,
                                    preferred_element_type=jnp.float32)
        i_g = sig(gates[:, 0 * H:1 * H])
        f_g = sig(gates[:, 1 * H:2 * H])
        g_g = jnp.tanh(gates[:, 2 * H:3 * H])
        o_g = sig(gates[:, 3 * H:4 * H])
        c_new = f_g * c + i_g * g_g
        h_new = o_g * jnp.tanh(c_new)
        # PackedSequence semantics: hold h/c once t >= length[b].
        live = t < len_col                                   # (Bt, 1) bool
        h = jnp.where(live, h_new, h)
        c = jnp.where(live, c_new, c)
        return h, c

    h0 = jnp.zeros((Bt, H), jnp.float32)
    c0 = jnp.zeros((Bt, H), jnp.float32)
    unroll = T if T <= 16 else 4
    h_fin, _ = lax.fori_loop(0, T, step, (h0, c0), unroll=unroll)

    # --- 4. Head: concat-free fc1 (split weight) -> relu -> fc2 (lane-dense out).
    #        dropout1 / dropout2 are eval-mode identities. ---
    hidden = (jnp.dot(img_act.astype(w1i_ref.dtype), w1i_ref[...],
                      preferred_element_type=jnp.float32)
              + jnp.dot(h_fin.astype(w1q_ref.dtype), w1q_ref[...],
                        preferred_element_type=jnp.float32)
              + b1_ref[...])                                 # (Bt, F) f32
    hidden = jnp.maximum(hidden, 0.0)
    out_ref[...] = (jnp.dot(hidden.astype(w2_ref.dtype), w2_ref[...],
                            preferred_element_type=jnp.float32)
                    + b2_ref[...])                           # (Bt, A_pad)


# ----------------------------------------------------------------------------
# Full VQAnet forward (wrapper: gather, GAP, padding to hardware tiles, slice)
# ----------------------------------------------------------------------------
@jax.jit
def vqanet_forward(params, images, questions, lengths):
    B, C, Hs, Ws = images.shape
    T = questions.shape[0]
    E = params["embedding"].shape[1]
    R = params["w_img"].shape[1]
    H = params["w_hh"].shape[0]
    F = params["w_fc1"].shape[1]
    A = params["w_fc2"].shape[1]

    # Hardware-tile padding (sublane multiple for B, lane multiple elsewhere).
    Bt = min(128, _round_up(B, 8))
    Bp = _round_up(B, Bt)
    Cp = _round_up(C, 128)
    Ep = _round_up(E, 128)
    Hp = _round_up(H, 128)
    Rp = _round_up(R, 128)
    Fp = _round_up(F, 128)
    Ap = _round_up(A, 128)
    bf16 = jnp.bfloat16

    # Frozen-backbone stand-in pooling runs outside the kernel (HBM-BW bound).
    gap = images.astype(jnp.float32).mean(axis=(2, 3))               # (B, C)
    gap_pad = _pad2d(gap, Bp, Cp, bf16)

    # Embedding lookup (glue: XLA gather) at padded width, then batch-pad.
    emb_tbl = _pad2d(params["embedding"], params["embedding"].shape[0], Ep, bf16)
    emb = jnp.take(emb_tbl, questions, axis=0)                        # (T, B, Ep)
    emb_pad = jnp.zeros((T, Bp, Ep), bf16).at[:, :B, :].set(emb)

    len_pad = jnp.zeros((Bp, 1), jnp.int32).at[:B, 0].set(lengths.astype(jnp.int32))

    # Weights: bf16 MXU operands (f32 accumulation in-kernel), f32 biases.
    wimg = _pad2d(params["w_img"], Cp, Rp, bf16)
    bimg = _pad2d(params["b_img"], 1, Rp, jnp.float32)
    wih = _pad_gate_cols(params["w_ih"], Ep, H, Hp, bf16)
    whh = _pad_gate_cols(params["w_hh"], Hp, H, Hp, bf16)
    blstm = _pad_gate_cols(params["b_lstm"], 1, H, Hp, jnp.float32)
    w1 = params["w_fc1"]
    w1i = _pad2d(w1[:R], Rp, Fp, bf16)       # image rows of fc1
    w1q = _pad2d(w1[R:], Hp, Fp, bf16)       # question rows of fc1
    b1 = _pad2d(params["b_fc1"], 1, Fp, jnp.float32)
    w2 = _pad2d(params["w_fc2"], Fp, Ap, bf16)
    b2 = _pad2d(params["b_fc2"], 1, Ap, jnp.float32)

    out_pad = pl.pallas_call(
        vqanet_kernel,
        out_shape=jax.ShapeDtypeStruct((Bp, Ap), jnp.float32),
        grid=(Bp // Bt,),
        in_specs=[
            pl.BlockSpec((Bt, Cp), lambda b: (b, 0)),
            pl.BlockSpec((T, Bt, Ep), lambda b: (0, b, 0)),
            pl.BlockSpec((Bt, 1), lambda b: (b, 0)),
            pl.BlockSpec((Cp, Rp), lambda b: (0, 0)),
            pl.BlockSpec((1, Rp), lambda b: (0, 0)),
            pl.BlockSpec((Ep, 4 * Hp), lambda b: (0, 0)),
            pl.BlockSpec((Hp, 4 * Hp), lambda b: (0, 0)),
            pl.BlockSpec((1, 4 * Hp), lambda b: (0, 0)),
            pl.BlockSpec((Rp, Fp), lambda b: (0, 0)),
            pl.BlockSpec((Hp, Fp), lambda b: (0, 0)),
            pl.BlockSpec((1, Fp), lambda b: (0, 0)),
            pl.BlockSpec((Fp, Ap), lambda b: (0, 0)),
            pl.BlockSpec((1, Ap), lambda b: (0, 0)),
        ],
        out_specs=pl.BlockSpec((Bt, Ap), lambda b: (b, 0)),
        scratch_shapes=[pltpu.VMEM((T, Bt, 4 * Hp), jnp.float32)],
        compiler_params=pltpu.CompilerParams(
            dimension_semantics=("parallel",),
            vmem_limit_bytes=32 * 1024 * 1024),
    )(gap_pad, emb_pad, len_pad,
      wimg, bimg, wih, whh, blstm,
      w1i, w1q, b1, w2, b2)

    return out_pad[:B, :A]


def init_params(key, *, num_vocab, embedding_size, lstm_size, fc_size,
                num_answers, resnet_size, in_channels):
    ks = jax.random.split(key, 8)
    scale = 0.05
    H = lstm_size
    return {
        # stand-in "resnet" feature projection
        "w_img": scale * jax.random.normal(ks[0], (in_channels, resnet_size), jnp.float32),
        "b_img": scale * jax.random.normal(ks[1], (1, resnet_size), jnp.float32),
        # embedding
        "embedding": scale * jax.random.normal(ks[2], (num_vocab, embedding_size), jnp.float32),
        # LSTM, PyTorch gate order i,f,g,o; matmul layout (in, 4H);
        # b_lstm = b_ih + b_hh combined.
        "w_ih": scale * jax.random.normal(ks[3], (embedding_size, 4 * H), jnp.float32),
        "w_hh": scale * jax.random.normal(ks[4], (H, 4 * H), jnp.float32),
        "b_lstm": scale * jax.random.normal(ks[5], (1, 4 * H), jnp.float32),
        # head
        "w_fc1": scale * jax.random.normal(ks[6], (resnet_size + H, fc_size), jnp.float32),
        "b_fc1": jnp.zeros((1, fc_size), jnp.float32),
        "w_fc2": scale * jax.random.normal(ks[7], (fc_size, num_answers), jnp.float32),
        "b_fc2": jnp.zeros((1, num_answers), jnp.float32),
    }


if __name__ == "__main__":
    # Small, forward-consistent shapes.
    B, C, HW = 2, 4, 16          # images: [2, 4, 16, 16]
    T = 8                        # seq length
    num_vocab = 50
    embedding_size = 32
    lstm_size = 32
    fc_size = 32
    num_answers = 10
    resnet_size = 64             # stand-in for resnet152 fc.in_features

    key = jax.random.PRNGKey(0)
    k_img, k_q, k_p = jax.random.split(key, 3)

    images = jax.random.normal(k_img, (B, C, HW, HW), jnp.float32)
    questions = jax.random.randint(k_q, (T, B), 0, num_vocab, jnp.int32)
    lengths = jnp.array([T, T - 3], jnp.int32)     # variable lengths (packed-seq)

    params = init_params(
        k_p, num_vocab=num_vocab, embedding_size=embedding_size,
        lstm_size=lstm_size, fc_size=fc_size, num_answers=num_answers,
        resnet_size=resnet_size, in_channels=C)

    out = vqanet_forward(params, images, questions, lengths)
    jax.block_until_ready(out)
    assert out.shape == (B, num_answers), out.shape
    print("KERNEL_OK")
</pallas_src>

<mosaic_0001>
module attributes {stable_mosaic.version = 11 : i64} {
  func.func @vqanet_kernel(%arg0: i32, %arg1: memref<8x128xbf16, #tpu.memory_space<vmem>>, %arg2: memref<8x8x128xbf16, #tpu.memory_space<vmem>>, %arg3: memref<8x1xi32, #tpu.memory_space<vmem>>, %arg4: memref<128x128xbf16, #tpu.memory_space<vmem>>, %arg5: memref<1x128xf32, #tpu.memory_space<vmem>>, %arg6: memref<128x512xbf16, #tpu.memory_space<vmem>>, %arg7: memref<128x512xbf16, #tpu.memory_space<vmem>>, %arg8: memref<1x512xf32, #tpu.memory_space<vmem>>, %arg9: memref<128x128xbf16, #tpu.memory_space<vmem>>, %arg10: memref<128x128xbf16, #tpu.memory_space<vmem>>, %arg11: memref<1x128xf32, #tpu.memory_space<vmem>>, %arg12: memref<128x128xbf16, #tpu.memory_space<vmem>>, %arg13: memref<1x128xf32, #tpu.memory_space<vmem>>, %arg14: memref<8x128xf32, #tpu.memory_space<vmem>>, %arg15: memref<8x8x512xf32, #tpu.memory_space<vmem>>) attributes {dimension_semantics = [#tpu.dimension_semantics<parallel>], iteration_bounds = array<i64: 1>, scalar_prefetch = 0 : i64, scratch_operands = 1 : i64, tpu.core_type = #tpu.core_type<tc>, window_params = [{transform_indices = @transform_0, window_bounds = array<i64: 8, 128>}, {transform_indices = @transform_1, window_bounds = array<i64: 8, 8, 128>}, {transform_indices = @transform_2, window_bounds = array<i64: 8, 1>}, {pipeline_mode = #tpu.pipeline_mode<synchronous>, transform_indices = @transform_3, window_bounds = array<i64: 128, 128>}, {pipeline_mode = #tpu.pipeline_mode<synchronous>, transform_indices = @transform_4, window_bounds = array<i64: 1, 128>}, {pipeline_mode = #tpu.pipeline_mode<synchronous>, transform_indices = @transform_5, window_bounds = array<i64: 128, 512>}, {pipeline_mode = #tpu.pipeline_mode<synchronous>, transform_indices = @transform_6, window_bounds = array<i64: 128, 512>}, {pipeline_mode = #tpu.pipeline_mode<synchronous>, transform_indices = @transform_7, window_bounds = array<i64: 1, 512>}, {pipeline_mode = #tpu.pipeline_mode<synchronous>, transform_indices = @transform_8, window_bounds = array<i64: 128, 128>}, {pipeline_mode = #tpu.pipeline_mode<synchronous>, transform_indices = @transform_9, window_bounds = array<i64: 128, 128>}, {pipeline_mode = #tpu.pipeline_mode<synchronous>, transform_indices = @transform_10, window_bounds = array<i64: 1, 128>}, {pipeline_mode = #tpu.pipeline_mode<synchronous>, transform_indices = @transform_11, window_bounds = array<i64: 128, 128>}, {pipeline_mode = #tpu.pipeline_mode<synchronous>, transform_indices = @transform_12, window_bounds = array<i64: 1, 128>}, {transform_indices = @transform_13, window_bounds = array<i64: 8, 128>}]} {
    %c0 = arith.constant 0 : index
    %c0_0 = arith.constant 0 : index
    %0 = vector.load %arg1[%c0, %c0_0] : memref<8x128xbf16, #tpu.memory_space<vmem>>, vector<8x128xbf16>
    %c0_1 = arith.constant 0 : index
    %c0_2 = arith.constant 0 : index
    %1 = vector.load %arg4[%c0_1, %c0_2] : memref<128x128xbf16, #tpu.memory_space<vmem>>, vector<128x128xbf16>
    %cst = arith.constant dense<0.000000e+00> : vector<8x128xf32>
    %2 = tpu.matmul %0, %1, %cst {dimension_numbers = #tpu.dot_dimension_numbers<[1], [0], [0], [1], [0, 0, 1, 1], [], []>} : vector<8x128xbf16>, vector<128x128xbf16>, vector<8x128xf32> -> vector<8x128xf32>
    %c0_3 = arith.constant 0 : index
    %c0_4 = arith.constant 0 : index
    %3 = vector.load %arg5[%c0_3, %c0_4] : memref<1x128xf32, #tpu.memory_space<vmem>>, vector<1x128xf32>
    %4 = vector.broadcast %3 : vector<1x128xf32> to vector<8x128xf32>
    %5 = arith.addf %2, %4 : vector<8x128xf32>
    %c0_5 = arith.constant 0 : index
    %c0_6 = arith.constant 0 : index
    %6 = vector.load %arg6[%c0_5, %c0_6] : memref<128x512xbf16, #tpu.memory_space<vmem>>, vector<128x512xbf16>
    %c0_7 = arith.constant 0 : index
    %c0_8 = arith.constant 0 : index
    %7 = vector.load %arg8[%c0_7, %c0_8] : memref<1x512xf32, #tpu.memory_space<vmem>>, vector<1x512xf32>
    %8 = vector.shape_cast %7 : vector<1x512xf32> to vector<1x512xf32>
    %9 = vector.broadcast %8 : vector<1x512xf32> to vector<8x512xf32>
    %c0_i32 = arith.constant 0 : i32
    %c8_i32 = arith.constant 8 : i32
    %10 = arith.addi %c0_i32, %c8_i32 : i32
    %c1_i32 = arith.constant 1 : i32
    scf.for %arg16 = %c0_i32 to %10 step %c1_i32  : i32 {
      %394 = arith.index_cast %arg16 : i32 to index
      %c0_131 = arith.constant 0 : index
      %c0_132 = arith.constant 0 : index
      %395 = vector.load %arg2[%394, %c0_131, %c0_132] : memref<8x8x128xbf16, #tpu.memory_space<vmem>>, vector<1x8x128xbf16>
      %396 = vector.shape_cast %395 : vector<1x8x128xbf16> to vector<8x128xbf16>
      %cst_133 = arith.constant dense<0.000000e+00> : vector<8x512xf32>
      %397 = tpu.matmul %396, %6, %cst_133 {dimension_numbers = #tpu.dot_dimension_numbers<[1], [0], [0], [1], [0, 0, 1, 1], [], []>} : vector<8x128xbf16>, vector<128x512xbf16>, vector<8x512xf32> -> vector<8x512xf32>
      %398 = arith.addf %397, %9 : vector<8x512xf32>
      %399 = arith.index_cast %arg16 : i32 to index
      %c0_134 = arith.constant 0 : index
      %c0_135 = arith.constant 0 : index
      %400 = vector.load %arg15[%399, %c0_134, %c0_135] : memref<8x8x512xf32, #tpu.memory_space<vmem>>, vector<1x8x512xf32>
      %401 = vector.shape_cast %400 : vector<1x8x512xf32> to vector<8x512xf32>
      %402 = vector.shape_cast %398 : vector<8x512xf32> to vector<1x8x512xf32>
      tpu.vector_store %arg15[%399, %c0_134, %c0_135], %402 {strides = array<i32>} : memref<8x8x512xf32, #tpu.memory_space<vmem>>, vector<1x8x512xf32>,
    }
    %c8_i32_9 = arith.constant 8 : i32
    %c0_10 = arith.constant 0 : index
    %c0_11 = arith.constant 0 : index
    %11 = vector.load %arg7[%c0_10, %c0_11] : memref<128x512xbf16, #tpu.memory_space<vmem>>, vector<128x512xbf16>
    %c0_12 = arith.constant 0 : index
    %c0_13 = arith.constant 0 : index
    %12 = vector.load %arg3[%c0_12, %c0_13] : memref<8x1xi32, #tpu.memory_space<vmem>>, vector<8x1xi32>
    %cst_14 = arith.constant 0.000000e+00 : f32
    %13 = vector.broadcast %cst_14 : f32 to vector<8x128xf32>
    %cst_15 = arith.constant 0.000000e+00 : f32
    %14 = vector.broadcast %cst_15 : f32 to vector<8x128xf32>
    %c0_i32_16 = arith.constant 0 : i32
    %15 = arith.index_cast %c0_i32_16 : i32 to index
    %c0_17 = arith.constant 0 : index
    %c0_18 = arith.constant 0 : index
    %16 = vector.load %arg15[%15, %c0_17, %c0_18] : memref<8x8x512xf32, #tpu.memory_space<vmem>>, vector<1x8x512xf32>
    %17 = vector.shape_cast %16 : vector<1x8x512xf32> to vector<8x512xf32>
    %18 = arith.truncf %13 : vector<8x128xf32> to vector<8x128xbf16>
    %cst_19 = arith.constant dense<0.000000e+00> : vector<8x512xf32>
    %19 = tpu.matmul %18, %11, %cst_19 {dimension_numbers = #tpu.dot_dimension_numbers<[1], [0], [0], [1], [0, 0, 1, 1], [], []>} : vector<8x128xbf16>, vector<128x512xbf16>, vector<8x512xf32> -> vector<8x512xf32>
    %20 = arith.addf %17, %19 : vector<8x512xf32>
    %21 = vector.extract_strided_slice %20 {offsets = [0, 0], sizes = [8, 128], strides = [1, 1]} : vector<8x512xf32> to vector<8x128xf32>
    %cst_20 = arith.constant 5.000000e-01 : f32
    %22 = vector.broadcast %cst_20 : f32 to vector<8x128xf32>
    %23 = arith.mulf %22, %21 : vector<8x128xf32>
    %24 = math.tanh %23 : vector<8x128xf32>
    %cst_21 = arith.constant 1.000000e+00 : f32
    %25 = vector.broadcast %cst_21 : f32 to vector<8x128xf32>
    %26 = arith.addf %24, %25 : vector<8x128xf32>
    %cst_22 = arith.constant 5.000000e-01 : f32
    %27 = vector.broadcast %cst_22 : f32 to vector<8x128xf32>
    %28 = arith.mulf %27, %26 : vector<8x128xf32>
    %29 = vector.extract_strided_slice %20 {offsets = [0, 128], sizes = [8, 128], strides = [1, 1]} : vector<8x512xf32> to vector<8x128xf32>
    %cst_23 = arith.constant 5.000000e-01 : f32
    %30 = vector.broadcast %cst_23 : f32 to vector<8x128xf32>
    %31 = arith.mulf %30, %29 : vector<8x128xf32>
    %32 = math.tanh %31 : vector<8x128xf32>
    %cst_24 = arith.constant 1.000000e+00 : f32
    %33 = vector.broadcast %cst_24 : f32 to vector<8x128xf32>
    %34 = arith.addf %32, %33 : vector<8x128xf32>
    %cst_25 = arith.constant 5.000000e-01 : f32
    %35 = vector.broadcast %cst_25 : f32 to vector<8x128xf32>
    %36 = arith.mulf %35, %34 : vector<8x128xf32>
    %37 = vector.extract_strided_slice %20 {offsets = [0, 256], sizes = [8, 128], strides = [1, 1]} : vector<8x512xf32> to vector<8x128xf32>
    %38 = math.tanh %37 : vector<8x128xf32>
    %39 = vector.extract_strided_slice %20 {offsets = [0, 384], sizes = [8, 128], strides = [1, 1]} : vector<8x512xf32> to vector<8x128xf32>
    %cst_26 = arith.constant 5.000000e-01 : f32
    %40 = vector.broadcast %cst_26 : f32 to vector<8x128xf32>
    %41 = arith.mulf %40, %39 : vector<8x128xf32>
    %42 = math.tanh %41 : vector<8x128xf32>
    %cst_27 = arith.constant 1.000000e+00 : f32
    %43 = vector.broadcast %cst_27 : f32 to vector<8x128xf32>
    %44 = arith.addf %42, %43 : vector<8x128xf32>
    %cst_28 = arith.constant 5.000000e-01 : f32
    %45 = vector.broadcast %cst_28 : f32 to vector<8x128xf32>
    %46 = arith.mulf %45, %44 : vector<8x128xf32>
    %47 = arith.mulf %36, %14 : vector<8x128xf32>
    %48 = arith.mulf %28, %38 : vector<8x128xf32>
    %49 = arith.addf %47, %48 : vector<8x128xf32>
    %50 = math.tanh %49 : vector<8x128xf32>
    %51 = arith.mulf %46, %50 : vector<8x128xf32>
    %52 = vector.broadcast %c0_i32_16 : i32 to vector<8x1xi32>
    %53 = arith.cmpi slt, %52, %12 : vector<8x1xi32>
    %54 = vector.shape_cast %53 : vector<8x1xi1> to vector<8x1xi1>
    %55 = vector.broadcast %54 : vector<8x1xi1> to vector<8x128xi1>
    %56 = arith.select %55, %51, %13 : vector<8x128xi1>, vector<8x128xf32>
    %57 = vector.shape_cast %53 : vector<8x1xi1> to vector<8x1xi1>
    %58 = vector.broadcast %57 : vector<8x1xi1> to vector<8x128xi1>
    %59 = arith.select %58, %49, %14 : vector<8x128xi1>, vector<8x128xf32>
    %c1_i32_29 = arith.constant 1 : i32
    %60 = arith.index_cast %c1_i32_29 : i32 to index
    %c0_30 = arith.constant 0 : index
    %c0_31 = arith.constant 0 : index
    %61 = vector.load %arg15[%60, %c0_30, %c0_31] : memref<8x8x512xf32, #tpu.memory_space<vmem>>, vector<1x8x512xf32>
    %62 = vector.shape_cast %61 : vector<1x8x512xf32> to vector<8x512xf32>
    %63 = arith.truncf %56 : vector<8x128xf32> to vector<8x128xbf16>
    %cst_32 = arith.constant dense<0.000000e+00> : vector<8x512xf32>
    %64 = tpu.matmul %63, %11, %cst_32 {dimension_numbers = #tpu.dot_dimension_numbers<[1], [0], [0], [1], [0, 0, 1, 1], [], []>} : vector<8x128xbf16>, vector<128x512xbf16>, vector<8x512xf32> -> vector<8x512xf32>
    %65 = arith.addf %62, %64 : vector<8x512xf32>
    %66 = vector.extract_strided_slice %65 {offsets = [0, 0], sizes = [8, 128], strides = [1, 1]} : vector<8x512xf32> to vector<8x128xf32>
    %cst_33 = arith.constant 5.000000e-01 : f32
    %67 = vector.broadcast %cst_33 : f32 to vector<8x128xf32>
    %68 = arith.mulf %67, %66 : vector<8x128xf32>
    %69 = math.tanh %68 : vector<8x128xf32>
    %cst_34 = arith.constant 1.000000e+00 : f32
    %70 = vector.broadcast %cst_34 : f32 to vector<8x128xf32>
    %71 = arith.addf %69, %70 : vector<8x128xf32>
    %cst_35 = arith.constant 5.000000e-01 : f32
    %72 = vector.broadcast %cst_35 : f32 to vector<8x128xf32>
    %73 = arith.mulf %72, %71 : vector<8x128xf32>
    %74 = vector.extract_strided_slice %65 {offsets = [0, 128], sizes = [8, 128], strides = [1, 1]} : vector<8x512xf32> to vector<8x128xf32>
    %cst_36 = arith.constant 5.000000e-01 : f32
    %75 = vector.broadcast %cst_36 : f32 to vector<8x128xf32>
    %76 = arith.mulf %75, %74 : vector<8x128xf32>
    %77 = math.tanh %76 : vector<8x128xf32>
    %cst_37 = arith.constant 1.000000e+00 : f32
    %78 = vector.broadcast %cst_37 : f32 to vector<8x128xf32>
    %79 = arith.addf %77, %78 : vector<8x128xf32>
    %cst_38 = arith.constant 5.000000e-01 : f32
    %80 = vector.broadcast %cst_38 : f32 to vector<8x128xf32>
    %81 = arith.mulf %80, %79 : vector<8x128xf32>
    %82 = vector.extract_strided_slice %65 {offsets = [0, 256], sizes = [8, 128], strides = [1, 1]} : vector<8x512xf32> to vector<8x128xf32>
    %83 = math.tanh %82 : vector<8x128xf32>
    %84 = vector.extract_strided_slice %65 {offsets = [0, 384], sizes = [8, 128], strides = [1, 1]} : vector<8x512xf32> to vector<8x128xf32>
    %cst_39 = arith.constant 5.000000e-01 : f32
    %85 = vector.broadcast %cst_39 : f32 to vector<8x128xf32>
    %86 = arith.mulf %85, %84 : vector<8x128xf32>
    %87 = math.tanh %86 : vector<8x128xf32>
    %cst_40 = arith.constant 1.000000e+00 : f32
    %88 = vector.broadcast %cst_40 : f32 to vector<8x128xf32>
    %89 = arith.addf %87, %88 : vector<8x128xf32>
    %cst_41 = arith.constant 5.000000e-01 : f32
    %90 = vector.broadcast %cst_41 : f32 to vector<8x128xf32>
    %91 = arith.mulf %90, %89 : vector<8x128xf32>
    %92 = arith.mulf %81, %59 : vector<8x128xf32>
    %93 = arith.mulf %73, %83 : vector<8x128xf32>
    %94 = arith.addf %92, %93 : vector<8x128xf32>
    %95 = math.tanh %94 : vector<8x128xf32>
    %96 = arith.mulf %91, %95 : vector<8x128xf32>
    %97 = vector.broadcast %c1_i32_29 : i32 to vector<8x1xi32>
    %98 = arith.cmpi slt, %97, %12 : vector<8x1xi32>
    %99 = vector.shape_cast %98 : vector<8x1xi1> to vector<8x1xi1>
    %100 = vector.broadcast %99 : vector<8x1xi1> to vector<8x128xi1>
    %101 = arith.select %100, %96, %56 : vector<8x128xi1>, vector<8x128xf32>
    %102 = vector.shape_cast %98 : vector<8x1xi1> to vector<8x1xi1>
    %103 = vector.broadcast %102 : vector<8x1xi1> to vector<8x128xi1>
    %104 = arith.select %103, %94, %59 : vector<8x128xi1>, vector<8x128xf32>
    %c2_i32 = arith.constant 2 : i32
    %105 = arith.index_cast %c2_i32 : i32 to index
    %c0_42 = arith.constant 0 : index
    %c0_43 = arith.constant 0 : index
    %106 = vector.load %arg15[%105, %c0_42, %c0_43] : memref<8x8x512xf32, #tpu.memory_space<vmem>>, vector<1x8x512xf32>
    %107 = vector.shape_cast %106 : vector<1x8x512xf32> to vector<8x512xf32>
    %108 = arith.truncf %101 : vector<8x128xf32> to vector<8x128xbf16>
    %cst_44 = arith.constant dense<0.000000e+00> : vector<8x512xf32>
    %109 = tpu.matmul %108, %11, %cst_44 {dimension_numbers = #tpu.dot_dimension_numbers<[1], [0], [0], [1], [0, 0, 1, 1], [], []>} : vector<8x128xbf16>, vector<128x512xbf16>, vector<8x512xf32> -> vector<8x512xf32>
    %110 = arith.addf %107, %109 : vector<8x512xf32>
    %111 = vector.extract_strided_slice %110 {offsets = [0, 0], sizes = [8, 128], strides = [1, 1]} : vector<8x512xf32> to vector<8x128xf32>
    %cst_45 = arith.constant 5.000000e-01 : f32
    %112 = vector.broadcast %cst_45 : f32 to vector<8x128xf32>
    %113 = arith.mulf %112, %111 : vector<8x128xf32>
    %114 = math.tanh %113 : vector<8x128xf32>
    %cst_46 = arith.constant 1.000000e+00 : f32
    %115 = vector.broadcast %cst_46 : f32 to vector<8x128xf32>
    %116 = arith.addf %114, %115 : vector<8x128xf32>
    %cst_47 = arith.constant 5.000000e-01 : f32
    %117 = vector.broadcast %cst_47 : f32 to vector<8x128xf32>
    %118 = arith.mulf %117, %116 : vector<8x128xf32>
    %119 = vector.extract_strided_slice %110 {offsets = [0, 128], sizes = [8, 128], strides = [1, 1]} : vector<8x512xf32> to vector<8x128xf32>
    %cst_48 = arith.constant 5.000000e-01 : f32
    %120 = vector.broadcast %cst_48 : f32 to vector<8x128xf32>
    %121 = arith.mulf %120, %119 : vector<8x128xf32>
    %122 = math.tanh %121 : vector<8x128xf32>
    %cst_49 = arith.constant 1.000000e+00 : f32
    %123 = vector.broadcast %cst_49 : f32 to vector<8x128xf32>
    %124 = arith.addf %122, %123 : vector<8x128xf32>
    %cst_50 = arith.constant 5.000000e-01 : f32
    %125 = vector.broadcast %cst_50 : f32 to vector<8x128xf32>
    %126 = arith.mulf %125, %124 : vector<8x128xf32>
    %127 = vector.extract_strided_slice %110 {offsets = [0, 256], sizes = [8, 128], strides = [1, 1]} : vector<8x512xf32> to vector<8x128xf32>
    %128 = math.tanh %127 : vector<8x128xf32>
    %129 = vector.extract_strided_slice %110 {offsets = [0, 384], sizes = [8, 128], strides = [1, 1]} : vector<8x512xf32> to vector<8x128xf32>
    %cst_51 = arith.constant 5.000000e-01 : f32
    %130 = vector.broadcast %cst_51 : f32 to vector<8x128xf32>
    %131 = arith.mulf %130, %129 : vector<8x128xf32>
    %132 = math.tanh %131 : vector<8x128xf32>
    %cst_52 = arith.constant 1.000000e+00 : f32
    %133 = vector.broadcast %cst_52 : f32 to vector<8x128xf32>
    %134 = arith.addf %132, %133 : vector<8x128xf32>
    %cst_53 = arith.constant 5.000000e-01 : f32
    %135 = vector.broadcast %cst_53 : f32 to vector<8x128xf32>
    %136 = arith.mulf %135, %134 : vector<8x128xf32>
    %137 = arith.mulf %126, %104 : vector<8x128xf32>
    %138 = arith.mulf %118, %128 : vector<8x128xf32>
    %139 = arith.addf %137, %138 : vector<8x128xf32>
    %140 = math.tanh %139 : vector<8x128xf32>
    %141 = arith.mulf %136, %140 : vector<8x128xf32>
    %142 = vector.broadcast %c2_i32 : i32 to vector<8x1xi32>
    %143 = arith.cmpi slt, %142, %12 : vector<8x1xi32>
    %144 = vector.shape_cast %143 : vector<8x1xi1> to vector<8x1xi1>
    %145 = vector.broadcast %144 : vector<8x1xi1> to vector<8x128xi1>
    %146 = arith.select %145, %141, %101 : vector<8x128xi1>, vector<8x128xf32>
    %147 = vector.shape_cast %143 : vector<8x1xi1> to vector<8x1xi1>
    %148 = vector.broadcast %147 : vector<8x1xi1> to vector<8x128xi1>
    %149 = arith.select %148, %139, %104 : vector<8x128xi1>, vector<8x128xf32>
    %c3_i32 = arith.constant 3 : i32
    %150 = arith.index_cast %c3_i32 : i32 to index
    %c0_54 = arith.constant 0 : index
    %c0_55 = arith.constant 0 : index
    %151 = vector.load %arg15[%150, %c0_54, %c0_55] : memref<8x8x512xf32, #tpu.memory_space<vmem>>, vector<1x8x512xf32>
    %152 = vector.shape_cast %151 : vector<1x8x512xf32> to vector<8x512xf32>
    %153 = arith.truncf %146 : vector<8x128xf32> to vector<8x128xbf16>
    %cst_56 = arith.constant dense<0.000000e+00> : vector<8x512xf32>
    %154 = tpu.matmul %153, %11, %cst_56 {dimension_numbers = #tpu.dot_dimension_numbers<[1], [0], [0], [1], [0, 0, 1, 1], [], []>} : vector<8x128xbf16>, vector<128x512xbf16>, vector<8x512xf32> -> vector<8x512xf32>
    %155 = arith.addf %152, %154 : vector<8x512xf32>
    %156 = vector.extract_strided_slice %155 {offsets = [0, 0], sizes = [8, 128], strides = [1, 1]} : vector<8x512xf32> to vector<8x128xf32>
    %cst_57 = arith.constant 5.000000e-01 : f32
    %157 = vector.broadcast %cst_57 : f32 to vector<8x128xf32>
    %158 = arith.mulf %157, %156 : vector<8x128xf32>
    %159 = math.tanh %158 : vector<8x128xf32>
    %cst_58 = arith.constant 1.000000e+00 : f32
    %160 = vector.broadcast %cst_58 : f32 to vector<8x128xf32>
    %161 = arith.addf %159, %160 : vector<8x128xf32>
    %cst_59 = arith.constant 5.000000e-01 : f32
    %162 = vector.broadcast %cst_59 : f32 to vector<8x128xf32>
    %163 = arith.mulf %162, %161 : vector<8x128xf32>
    %164 = vector.extract_strided_slice %155 {offsets = [0, 128], sizes = [8, 128], strides = [1, 1]} : vector<8x512xf32> to vector<8x128xf32>
    %cst_60 = arith.constant 5.000000e-01 : f32
    %165 = vector.broadcast %cst_60 : f32 to vector<8x128xf32>
    %166 = arith.mulf %165, %164 : vector<8x128xf32>
    %167 = math.tanh %166 : vector<8x128xf32>
    %cst_61 = arith.constant 1.000000e+00 : f32
    %168 = vector.broadcast %cst_61 : f32 to vector<8x128xf32>
    %169 = arith.addf %167, %168 : vector<8x128xf32>
    %cst_62 = arith.constant 5.000000e-01 : f32
    %170 = vector.broadcast %cst_62 : f32 to vector<8x128xf32>
    %171 = arith.mulf %170, %169 : vector<8x128xf32>
    %172 = vector.extract_strided_slice %155 {offsets = [0, 256], sizes = [8, 128], strides = [1, 1]} : vector<8x512xf32> to vector<8x128xf32>
    %173 = math.tanh %172 : vector<8x128xf32>
    %174 = vector.extract_strided_slice %155 {offsets = [0, 384], sizes = [8, 128], strides = [1, 1]} : vector<8x512xf32> to vector<8x128xf32>
    %cst_63 = arith.constant 5.000000e-01 : f32
    %175 = vector.broadcast %cst_63 : f32 to vector<8x128xf32>
    %176 = arith.mulf %175, %174 : vector<8x128xf32>
    %177 = math.tanh %176 : vector<8x128xf32>
    %cst_64 = arith.constant 1.000000e+00 : f32
    %178 = vector.broadcast %cst_64 : f32 to vector<8x128xf32>
    %179 = arith.addf %177, %178 : vector<8x128xf32>
    %cst_65 = arith.constant 5.000000e-01 : f32
    %180 = vector.broadcast %cst_65 : f32 to vector<8x128xf32>
    %181 = arith.mulf %180, %179 : vector<8x128xf32>
    %182 = arith.mulf %171, %149 : vector<8x128xf32>
    %183 = arith.mulf %163, %173 : vector<8x128xf32>
    %184 = arith.addf %182, %183 : vector<8x128xf32>
    %185 = math.tanh %184 : vector<8x128xf32>
    %186 = arith.mulf %181, %185 : vector<8x128xf32>
    %187 = vector.broadcast %c3_i32 : i32 to vector<8x1xi32>
    %188 = arith.cmpi slt, %187, %12 : vector<8x1xi32>
    %189 = vector.shape_cast %188 : vector<8x1xi1> to vector<8x1xi1>
    %190 = vector.broadcast %189 : vector<8x1xi1> to vector<8x128xi1>
    %191 = arith.select %190, %186, %146 : vector<8x128xi1>, vector<8x128xf32>
    %192 = vector.shape_cast %188 : vector<8x1xi1> to vector<8x1xi1>
    %193 = vector.broadcast %192 : vector<8x1xi1> to vector<8x128xi1>
    %194 = arith.select %193, %184, %149 : vector<8x128xi1>, vector<8x128xf32>
    %c4_i32 = arith.constant 4 : i32
    %195 = arith.index_cast %c4_i32 : i32 to index
    %c0_66 = arith.constant 0 : index
    %c0_67 = arith.constant 0 : index
    %196 = vector.load %arg15[%195, %c0_66, %c0_67] : memref<8x8x512xf32, #tpu.memory_space<vmem>>, vector<1x8x512xf32>
    %197 = vector.shape_cast %196 : vector<1x8x512xf32> to vector<8x512xf32>
    %198 = arith.truncf %191 : vector<8x128xf32> to vector<8x128xbf16>
    %cst_68 = arith.constant dense<0.000000e+00> : vector<8x512xf32>
    %199 = tpu.matmul %198, %11, %cst_68 {dimension_numbers = #tpu.dot_dimension_numbers<[1], [0], [0], [1], [0, 0, 1, 1], [], []>} : vector<8x128xbf16>, vector<128x512xbf16>, vector<8x512xf32> -> vector<8x512xf32>
    %200 = arith.addf %197, %199 : vector<8x512xf32>
    %201 = vector.extract_strided_slice %200 {offsets = [0, 0], sizes = [8, 128], strides = [1, 1]} : vector<8x512xf32> to vector<8x128xf32>
    %cst_69 = arith.constant 5.000000e-01 : f32
    %202 = vector.broadcast %cst_69 : f32 to vector<8x128xf32>
    %203 = arith.mulf %202, %201 : vector<8x128xf32>
    %204 = math.tanh %203 : vector<8x128xf32>
    %cst_70 = arith.constant 1.000000e+00 : f32
    %205 = vector.broadcast %cst_70 : f32 to vector<8x128xf32>
    %206 = arith.addf %204, %205 : vector<8x128xf32>
    %cst_71 = arith.constant 5.000000e-01 : f32
    %207 = vector.broadcast %cst_71 : f32 to vector<8x128xf32>
    %208 = arith.mulf %207, %206 : vector<8x128xf32>
    %209 = vector.extract_strided_slice %200 {offsets = [0, 128], sizes = [8, 128], strides = [1, 1]} : vector<8x512xf32> to vector<8x128xf32>
    %cst_72 = arith.constant 5.000000e-01 : f32
    %210 = vector.broadcast %cst_72 : f32 to vector<8x128xf32>
    %211 = arith.mulf %210, %209 : vector<8x128xf32>
    %212 = math.tanh %211 : vector<8x128xf32>
    %cst_73 = arith.constant 1.000000e+00 : f32
    %213 = vector.broadcast %cst_73 : f32 to vector<8x128xf32>
    %214 = arith.addf %212, %213 : vector<8x128xf32>
    %cst_74 = arith.constant 5.000000e-01 : f32
    %215 = vector.broadcast %cst_74 : f32 to vector<8x128xf32>
    %216 = arith.mulf %215, %214 : vector<8x128xf32>
    %217 = vector.extract_strided_slice %200 {offsets = [0, 256], sizes = [8, 128], strides = [1, 1]} : vector<8x512xf32> to vector<8x128xf32>
    %218 = math.tanh %217 : vector<8x128xf32>
    %219 = vector.extract_strided_slice %200 {offsets = [0, 384], sizes = [8, 128], strides = [1, 1]} : vector<8x512xf32> to vector<8x128xf32>
    %cst_75 = arith.constant 5.000000e-01 : f32
    %220 = vector.broadcast %cst_75 : f32 to vector<8x128xf32>
    %221 = arith.mulf %220, %219 : vector<8x128xf32>
    %222 = math.tanh %221 : vector<8x128xf32>
    %cst_76 = arith.constant 1.000000e+00 : f32
    %223 = vector.broadcast %cst_76 : f32 to vector<8x128xf32>
    %224 = arith.addf %222, %223 : vector<8x128xf32>
    %cst_77 = arith.constant 5.000000e-01 : f32
    %225 = vector.broadcast %cst_77 : f32 to vector<8x128xf32>
    %226 = arith.mulf %225, %224 : vector<8x128xf32>
    %227 = arith.mulf %216, %194 : vector<8x128xf32>
    %228 = arith.mulf %208, %218 : vector<8x128xf32>
    %229 = arith.addf %227, %228 : vector<8x128xf32>
    %230 = math.tanh %229 : vector<8x128xf32>
    %231 = arith.mulf %226, %230 : vector<8x128xf32>
    %232 = vector.broadcast %c4_i32 : i32 to vector<8x1xi32>
    %233 = arith.cmpi slt, %232, %12 : vector<8x1xi32>
    %234 = vector.shape_cast %233 : vector<8x1xi1> to vector<8x1xi1>
    %235 = vector.broadcast %234 : vector<8x1xi1> to vector<8x128xi1>
    %236 = arith.select %235, %231, %191 : vector<8x128xi1>, vector<8x128xf32>
    %237 = vector.shape_cast %233 : vector<8x1xi1> to vector<8x1xi1>
    %238 = vector.broadcast %237 : vector<8x1xi1> to vector<8x128xi1>
    %239 = arith.select %238, %229, %194 : vector<8x128xi1>, vector<8x128xf32>
    %c5_i32 = arith.constant 5 : i32
    %240 = arith.index_cast %c5_i32 : i32 to index
    %c0_78 = arith.constant 0 : index
    %c0_79 = arith.constant 0 : index
    %241 = vector.load %arg15[%240, %c0_78, %c0_79] : memref<8x8x512xf32, #tpu.memory_space<vmem>>, vector<1x8x512xf32>
    %242 = vector.shape_cast %241 : vector<1x8x512xf32> to vector<8x512xf32>
    %243 = arith.truncf %236 : vector<8x128xf32> to vector<8x128xbf16>
    %cst_80 = arith.constant dense<0.000000e+00> : vector<8x512xf32>
    %244 = tpu.matmul %243, %11, %cst_80 {dimension_numbers = #tpu.dot_dimension_numbers<[1], [0], [0], [1], [0, 0, 1, 1], [], []>} : vector<8x128xbf16>, vector<128x512xbf16>, vector<8x512xf32> -> vector<8x512xf32>
    %245 = arith.addf %242, %244 : vector<8x512xf32>
    %246 = vector.extract_strided_slice %245 {offsets = [0, 0], sizes = [8, 128], strides = [1, 1]} : vector<8x512xf32> to vector<8x128xf32>
    %cst_81 = arith.constant 5.000000e-01 : f32
    %247 = vector.broadcast %cst_81 : f32 to vector<8x128xf32>
    %248 = arith.mulf %247, %246 : vector<8x128xf32>
    %249 = math.tanh %248 : vector<8x128xf32>
    %cst_82 = arith.constant 1.000000e+00 : f32
    %250 = vector.broadcast %cst_82 : f32 to vector<8x128xf32>
    %251 = arith.addf %249, %250 : vector<8x128xf32>
    %cst_83 = arith.constant 5.000000e-01 : f32
    %252 = vector.broadcast %cst_83 : f32 to vector<8x128xf32>
    %253 = arith.mulf %252, %251 : vector<8x128xf32>
    %254 = vector.extract_strided_slice %245 {offsets = [0, 128], sizes = [8, 128], strides = [1, 1]} : vector<8x512xf32> to vector<8x128xf32>
    %cst_84 = arith.constant 5.000000e-01 : f32
    %255 = vector.broadcast %cst_84 : f32 to vector<8x128xf32>
    %256 = arith.mulf %255, %254 : vector<8x128xf32>
    %257 = math.tanh %256 : vector<8x128xf32>
    %cst_85 = arith.constant 1.000000e+00 : f32
    %258 = vector.broadcast %cst_85 : f32 to vector<8x128xf32>
    %259 = arith.addf %257, %258 : vector<8x128xf32>
    %cst_86 = arith.constant 5.000000e-01 : f32
    %260 = vector.broadcast %cst_86 : f32 to vector<8x128xf32>
    %261 = arith.mulf %260, %259 : vector<8x128xf32>
    %262 = vector.extract_strided_slice %245 {offsets = [0, 256], sizes = [8, 128], strides = [1, 1]} : vector<8x512xf32> to vector<8x128xf32>
    %263 = math.tanh %262 : vector<8x128xf32>
    %264 = vector.extract_strided_slice %245 {offsets = [0, 384], sizes = [8, 128], strides = [1, 1]} : vector<8x512xf32> to vector<8x128xf32>
    %cst_87 = arith.constant 5.000000e-01 : f32
    %265 = vector.broadcast %cst_87 : f32 to vector<8x128xf32>
    %266 = arith.mulf %265, %264 : vector<8x128xf32>
    %267 = math.tanh %266 : vector<8x128xf32>
    %cst_88 = arith.constant 1.000000e+00 : f32
    %268 = vector.broadcast %cst_88 : f32 to vector<8x128xf32>
    %269 = arith.addf %267, %268 : vector<8x128xf32>
    %cst_89 = arith.constant 5.000000e-01 : f32
    %270 = vector.broadcast %cst_89 : f32 to vector<8x128xf32>
    %271 = arith.mulf %270, %269 : vector<8x128xf32>
    %272 = arith.mulf %261, %239 : vector<8x128xf32>
    %273 = arith.mulf %253, %263 : vector<8x128xf32>
    %274 = arith.addf %272, %273 : vector<8x128xf32>
    %275 = math.tanh %274 : vector<8x128xf32>
    %276 = arith.mulf %271, %275 : vector<8x128xf32>
    %277 = vector.broadcast %c5_i32 : i32 to vector<8x1xi32>
    %278 = arith.cmpi slt, %277, %12 : vector<8x1xi32>
    %279 = vector.shape_cast %278 : vector<8x1xi1> to vector<8x1xi1>
    %280 = vector.broadcast %279 : vector<8x1xi1> to vector<8x128xi1>
    %281 = arith.select %280, %276, %236 : vector<8x128xi1>, vector<8x128xf32>
    %282 = vector.shape_cast %278 : vector<8x1xi1> to vector<8x1xi1>
    %283 = vector.broadcast %282 : vector<8x1xi1> to vector<8x128xi1>
    %284 = arith.select %283, %274, %239 : vector<8x128xi1>, vector<8x128xf32>
    %c6_i32 = arith.constant 6 : i32
    %285 = arith.index_cast %c6_i32 : i32 to index
    %c0_90 = arith.constant 0 : index
    %c0_91 = arith.constant 0 : index
    %286 = vector.load %arg15[%285, %c0_90, %c0_91] : memref<8x8x512xf32, #tpu.memory_space<vmem>>, vector<1x8x512xf32>
    %287 = vector.shape_cast %286 : vector<1x8x512xf32> to vector<8x512xf32>
    %288 = arith.truncf %281 : vector<8x128xf32> to vector<8x128xbf16>
    %cst_92 = arith.constant dense<0.000000e+00> : vector<8x512xf32>
    %289 = tpu.matmul %288, %11, %cst_92 {dimension_numbers = #tpu.dot_dimension_numbers<[1], [0], [0], [1], [0, 0, 1, 1], [], []>} : vector<8x128xbf16>, vector<128x512xbf16>, vector<8x512xf32> -> vector<8x512xf32>
    %290 = arith.addf %287, %289 : vector<8x512xf32>
    %291 = vector.extract_strided_slice %290 {offsets = [0, 0], sizes = [8, 128], strides = [1, 1]} : vector<8x512xf32> to vector<8x128xf32>
    %cst_93 = arith.constant 5.000000e-01 : f32
    %292 = vector.broadcast %cst_93 : f32 to vector<8x128xf32>
    %293 = arith.mulf %292, %291 : vector<8x128xf32>
    %294 = math.tanh %293 : vector<8x128xf32>
    %cst_94 = arith.constant 1.000000e+00 : f32
    %295 = vector.broadcast %cst_94 : f32 to vector<8x128xf32>
    %296 = arith.addf %294, %295 : vector<8x128xf32>
    %cst_95 = arith.constant 5.000000e-01 : f32
    %297 = vector.broadcast %cst_95 : f32 to vector<8x128xf32>
    %298 = arith.mulf %297, %296 : vector<8x128xf32>
    %299 = vector.extract_strided_slice %290 {offsets = [0, 128], sizes = [8, 128], strides = [1, 1]} : vector<8x512xf32> to vector<8x128xf32>
    %cst_96 = arith.constant 5.000000e-01 : f32
    %300 = vector.broadcast %cst_96 : f32 to vector<8x128xf32>
    %301 = arith.mulf %300, %299 : vector<8x128xf32>
    %302 = math.tanh %301 : vector<8x128xf32>
    %cst_97 = arith.constant 1.000000e+00 : f32
    %303 = vector.broadcast %cst_97 : f32 to vector<8x128xf32>
    %304 = arith.addf %302, %303 : vector<8x128xf32>
    %cst_98 = arith.constant 5.000000e-01 : f32
    %305 = vector.broadcast %cst_98 : f32 to vector<8x128xf32>
    %306 = arith.mulf %305, %304 : vector<8x128xf32>
    %307 = vector.extract_strided_slice %290 {offsets = [0, 256], sizes = [8, 128], strides = [1, 1]} : vector<8x512xf32> to vector<8x128xf32>
    %308 = math.tanh %307 : vector<8x128xf32>
    %309 = vector.extract_strided_slice %290 {offsets = [0, 384], sizes = [8, 128], strides = [1, 1]} : vector<8x512xf32> to vector<8x128xf32>
    %cst_99 = arith.constant 5.000000e-01 : f32
    %310 = vector.broadcast %cst_99 : f32 to vector<8x128xf32>
    %311 = arith.mulf %310, %309 : vector<8x128xf32>
    %312 = math.tanh %311 : vector<8x128xf32>
    %cst_100 = arith.constant 1.000000e+00 : f32
    %313 = vector.broadcast %cst_100 : f32 to vector<8x128xf32>
    %314 = arith.addf %312, %313 : vector<8x128xf32>
    %cst_101 = arith.constant 5.000000e-01 : f32
    %315 = vector.broadcast %cst_101 : f32 to vector<8x128xf32>
    %316 = arith.mulf %315, %314 : vector<8x128xf32>
    %317 = arith.mulf %306, %284 : vector<8x128xf32>
    %318 = arith.mulf %298, %308 : vector<8x128xf32>
    %319 = arith.addf %317, %318 : vector<8x128xf32>
    %320 = math.tanh %319 : vector<8x128xf32>
    %321 = arith.mulf %316, %320 : vector<8x128xf32>
    %322 = vector.broadcast %c6_i32 : i32 to vector<8x1xi32>
    %323 = arith.cmpi slt, %322, %12 : vector<8x1xi32>
    %324 = vector.shape_cast %323 : vector<8x1xi1> to vector<8x1xi1>
    %325 = vector.broadcast %324 : vector<8x1xi1> to vector<8x128xi1>
    %326 = arith.select %325, %321, %281 : vector<8x128xi1>, vector<8x128xf32>
    %327 = vector.shape_cast %323 : vector<8x1xi1> to vector<8x1xi1>
    %328 = vector.broadcast %327 : vector<8x1xi1> to vector<8x128xi1>
    %329 = arith.select %328, %319, %284 : vector<8x128xi1>, vector<8x128xf32>
    %c7_i32 = arith.constant 7 : i32
    %330 = arith.index_cast %c7_i32 : i32 to index
    %c0_102 = arith.constant 0 : index
    %c0_103 = arith.constant 0 : index
    %331 = vector.load %arg15[%330, %c0_102, %c0_103] : memref<8x8x512xf32, #tpu.memory_space<vmem>>, vector<1x8x512xf32>
    %332 = vector.shape_cast %331 : vector<1x8x512xf32> to vector<8x512xf32>
    %333 = arith.truncf %326 : vector<8x128xf32> to vector<8x128xbf16>
    %cst_104 = arith.constant dense<0.000000e+00> : vector<8x512xf32>
    %334 = tpu.matmul %333, %11, %cst_104 {dimension_numbers = #tpu.dot_dimension_numbers<[1], [0], [0], [1], [0, 0, 1, 1], [], []>} : vector<8x128xbf16>, vector<128x512xbf16>, vector<8x512xf32> -> vector<8x512xf32>
    %335 = arith.addf %332, %334 : vector<8x512xf32>
    %336 = vector.extract_strided_slice %335 {offsets = [0, 0], sizes = [8, 128], strides = [1, 1]} : vector<8x512xf32> to vector<8x128xf32>
    %cst_105 = arith.constant 5.000000e-01 : f32
    %337 = vector.broadcast %cst_105 : f32 to vector<8x128xf32>
    %338 = arith.mulf %337, %336 : vector<8x128xf32>
    %339 = math.tanh %338 : vector<8x128xf32>
    %cst_106 = arith.constant 1.000000e+00 : f32
    %340 = vector.broadcast %cst_106 : f32 to vector<8x128xf32>
    %341 = arith.addf %339, %340 : vector<8x128xf32>
    %cst_107 = arith.constant 5.000000e-01 : f32
    %342 = vector.broadcast %cst_107 : f32 to vector<8x128xf32>
    %343 = arith.mulf %342, %341 : vector<8x128xf32>
    %344 = vector.extract_strided_slice %335 {offsets = [0, 128], sizes = [8, 128], strides = [1, 1]} : vector<8x512xf32> to vector<8x128xf32>
    %cst_108 = arith.constant 5.000000e-01 : f32
    %345 = vector.broadcast %cst_108 : f32 to vector<8x128xf32>
    %346 = arith.mulf %345, %344 : vector<8x128xf32>
    %347 = math.tanh %346 : vector<8x128xf32>
    %cst_109 = arith.constant 1.000000e+00 : f32
    %348 = vector.broadcast %cst_109 : f32 to vector<8x128xf32>
    %349 = arith.addf %347, %348 : vector<8x128xf32>
    %cst_110 = arith.constant 5.000000e-01 : f32
    %350 = vector.broadcast %cst_110 : f32 to vector<8x128xf32>
    %351 = arith.mulf %350, %349 : vector<8x128xf32>
    %352 = vector.extract_strided_slice %335 {offsets = [0, 256], sizes = [8, 128], strides = [1, 1]} : vector<8x512xf32> to vector<8x128xf32>
    %353 = math.tanh %352 : vector<8x128xf32>
    %354 = vector.extract_strided_slice %335 {offsets = [0, 384], sizes = [8, 128], strides = [1, 1]} : vector<8x512xf32> to vector<8x128xf32>
    %cst_111 = arith.constant 5.000000e-01 : f32
    %355 = vector.broadcast %cst_111 : f32 to vector<8x128xf32>
    %356 = arith.mulf %355, %354 : vector<8x128xf32>
    %357 = math.tanh %356 : vector<8x128xf32>
    %cst_112 = arith.constant 1.000000e+00 : f32
    %358 = vector.broadcast %cst_112 : f32 to vector<8x128xf32>
    %359 = arith.addf %357, %358 : vector<8x128xf32>
    %cst_113 = arith.constant 5.000000e-01 : f32
    %360 = vector.broadcast %cst_113 : f32 to vector<8x128xf32>
    %361 = arith.mulf %360, %359 : vector<8x128xf32>
    %362 = arith.mulf %351, %329 : vector<8x128xf32>
    %363 = arith.mulf %343, %353 : vector<8x128xf32>
    %364 = arith.addf %362, %363 : vector<8x128xf32>
    %365 = math.tanh %364 : vector<8x128xf32>
    %366 = arith.mulf %361, %365 : vector<8x128xf32>
    %367 = vector.broadcast %c7_i32 : i32 to vector<8x1xi32>
    %368 = arith.cmpi slt, %367, %12 : vector<8x1xi32>
    %369 = vector.shape_cast %368 : vector<8x1xi1> to vector<8x1xi1>
    %370 = vector.broadcast %369 : vector<8x1xi1> to vector<8x128xi1>
    %371 = arith.select %370, %366, %326 : vector<8x128xi1>, vector<8x128xf32>
    %372 = vector.shape_cast %368 : vector<8x1xi1> to vector<8x1xi1>
    %373 = vector.broadcast %372 : vector<8x1xi1> to vector<8x128xi1>
    %374 = arith.select %373, %364, %329 : vector<8x128xi1>, vector<8x128xf32>
    %c8_i32_114 = arith.constant 8 : i32
    %375 = arith.truncf %5 : vector<8x128xf32> to vector<8x128xbf16>
    %c0_115 = arith.constant 0 : index
    %c0_116 = arith.constant 0 : index
    %376 = vector.load %arg9[%c0_115, %c0_116] : memref<128x128xbf16, #tpu.memory_space<vmem>>, vector<128x128xbf16>
    %cst_117 = arith.constant dense<0.000000e+00> : vector<8x128xf32>
    %377 = tpu.matmul %375, %376, %cst_117 {dimension_numbers = #tpu.dot_dimension_numbers<[1], [0], [0], [1], [0, 0, 1, 1], [], []>} : vector<8x128xbf16>, vector<128x128xbf16>, vector<8x128xf32> -> vector<8x128xf32>
    %378 = arith.truncf %371 : vector<8x128xf32> to vector<8x128xbf16>
    %c0_118 = arith.constant 0 : index
    %c0_119 = arith.constant 0 : index
    %379 = vector.load %arg10[%c0_118, %c0_119] : memref<128x128xbf16, #tpu.memory_space<vmem>>, vector<128x128xbf16>
    %cst_120 = arith.constant dense<0.000000e+00> : vector<8x128xf32>
    %380 = tpu.matmul %378, %379, %cst_120 {dimension_numbers = #tpu.dot_dimension_numbers<[1], [0], [0], [1], [0, 0, 1, 1], [], []>} : vector<8x128xbf16>, vector<128x128xbf16>, vector<8x128xf32> -> vector<8x128xf32>
    %381 = arith.addf %377, %380 : vector<8x128xf32>
    %c0_121 = arith.constant 0 : index
    %c0_122 = arith.constant 0 : index
    %382 = vector.load %arg11[%c0_121, %c0_122] : memref<1x128xf32, #tpu.memory_space<vmem>>, vector<1x128xf32>
    %383 = vector.broadcast %382 : vector<1x128xf32> to vector<8x128xf32>
    %384 = arith.addf %381, %383 : vector<8x128xf32>
    %cst_123 = arith.constant 0.000000e+00 : f32
    %385 = vector.broadcast %cst_123 : f32 to vector<8x128xf32>
    %386 = arith.maximumf %384, %385 : vector<8x128xf32>
    %387 = arith.truncf %386 : vector<8x128xf32> to vector<8x128xbf16>
    %c0_124 = arith.constant 0 : index
    %c0_125 = arith.constant 0 : index
    %388 = vector.load %arg12[%c0_124, %c0_125] : memref<128x128xbf16, #tpu.memory_space<vmem>>, vector<128x128xbf16>
    %cst_126 = arith.constant dense<0.000000e+00> : vector<8x128xf32>
    %389 = tpu.matmul %387, %388, %cst_126 {dimension_numbers = #tpu.dot_dimension_numbers<[1], [0], [0], [1], [0, 0, 1, 1], [], []>} : vector<8x128xbf16>, vector<128x128xbf16>, vector<8x128xf32> -> vector<8x128xf32>
    %c0_127 = arith.constant 0 : index
    %c0_128 = arith.constant 0 : index
    %390 = vector.load %arg13[%c0_127, %c0_128] : memref<1x128xf32, #tpu.memory_space<vmem>>, vector<1x128xf32>
    %391 = vector.broadcast %390 : vector<1x128xf32> to vector<8x128xf32>
    %392 = arith.addf %389, %391 : vector<8x128xf32>
    %c0_129 = arith.constant 0 : index
    %c0_130 = arith.constant 0 : index
    %393 = vector.load %arg14[%c0_129, %c0_130] : memref<8x128xf32, #tpu.memory_space<vmem>>, vector<8x128xf32>
    tpu.vector_store %arg14[%c0_129, %c0_130], %392 {strides = array<i32>} : memref<8x128xf32, #tpu.memory_space<vmem>>, vector<8x128xf32>,
    return
  }
  func.func @transform_0(%arg0: i32) -> (i32, i32) {
    %c0_i32 = arith.constant 0 : i32
    %c0_i32_0 = arith.constant 0 : i32
    return %arg0, %c0_i32 : i32, i32
  }
  func.func @transform_1(%arg0: i32) -> (i32, i32, i32) {
    %c0_i32 = arith.constant 0 : i32
    %c0_i32_0 = arith.constant 0 : i32
    %c0_i32_1 = arith.constant 0 : i32
    return %c0_i32, %arg0, %c0_i32_0 : i32, i32, i32
  }
  func.func @transform_2(%arg0: i32) -> (i32, i32) {
    %c0_i32 = arith.constant 0 : i32
    %c0_i32_0 = arith.constant 0 : i32
    return %arg0, %c0_i32 : i32, i32
  }
  func.func @transform_3(%arg0: i32) -> (i32, i32) {
    %c0_i32 = arith.constant 0 : i32
    %c0_i32_0 = arith.constant 0 : i32
    %c0_i32_1 = arith.constant 0 : i32
    return %c0_i32, %c0_i32_0 : i32, i32
  }
  func.func @transform_4(%arg0: i32) -> (i32, i32) {
    %c0_i32 = arith.constant 0 : i32
    %c0_i32_0 = arith.constant 0 : i32
    %c0_i32_1 = arith.constant 0 : i32
    return %c0_i32, %c0_i32_0 : i32, i32
  }
  func.func @transform_5(%arg0: i32) -> (i32, i32) {
    %c0_i32 = arith.constant 0 : i32
    %c0_i32_0 = arith.constant 0 : i32
    %c0_i32_1 = arith.constant 0 : i32
    return %c0_i32, %c0_i32_0 : i32, i32
  }
  func.func @transform_6(%arg0: i32) -> (i32, i32) {
    %c0_i32 = arith.constant 0 : i32
    %c0_i32_0 = arith.constant 0 : i32
    %c0_i32_1 = arith.constant 0 : i32
    return %c0_i32, %c0_i32_0 : i32, i32
  }
  func.func @transform_7(%arg0: i32) -> (i32, i32) {
    %c0_i32 = arith.constant 0 : i32
    %c0_i32_0 = arith.constant 0 : i32
    %c0_i32_1 = arith.constant 0 : i32
    return %c0_i32, %c0_i32_0 : i32, i32
  }
  func.func @transform_8(%arg0: i32) -> (i32, i32) {
    %c0_i32 = arith.constant 0 : i32
    %c0_i32_0 = arith.constant 0 : i32
    %c0_i32_1 = arith.constant 0 : i32
    return %c0_i32, %c0_i32_0 : i32, i32
  }
  func.func @transform_9(%arg0: i32) -> (i32, i32) {
    %c0_i32 = arith.constant 0 : i32
    %c0_i32_0 = arith.constant 0 : i32
    %c0_i32_1 = arith.constant 0 : i32
    return %c0_i32, %c0_i32_0 : i32, i32
  }
  func.func @transform_10(%arg0: i32) -> (i32, i32) {
    %c0_i32 = arith.constant 0 : i32
    %c0_i32_0 = arith.constant 0 : i32
    %c0_i32_1 = arith.constant 0 : i32
    return %c0_i32, %c0_i32_0 : i32, i32
  }
  func.func @transform_11(%arg0: i32) -> (i32, i32) {
    %c0_i32 = arith.constant 0 : i32
    %c0_i32_0 = arith.constant 0 : i32
    %c0_i32_1 = arith.constant 0 : i32
    return %c0_i32, %c0_i32_0 : i32, i32
  }
  func.func @transform_12(%arg0: i32) -> (i32, i32) {
    %c0_i32 = arith.constant 0 : i32
    %c0_i32_0 = arith.constant 0 : i32
    %c0_i32_1 = arith.constant 0 : i32
    return %c0_i32, %c0_i32_0 : i32, i32
  }
  func.func @transform_13(%arg0: i32) -> (i32, i32) {
    %c0_i32 = arith.constant 0 : i32
    %c0_i32_0 = arith.constant 0 : i32
    return %arg0, %c0_i32 : i32, i32
  }
}

</mosaic_0001>

<bundles_post_ra>
// kernel: vqanet_forward.1
= control target key start
LH: loop header
LB: loop body
LE: loop exit
PB: predicated region body
PF: predicated region fallthrough
CT: control target
= control target key end

     0   :  { %v2387_v0 = vmov 0.0   ;;  %vm2388_vm0 = vmmov 0   ;;  %v191_v10 = vlaneseq  ;;  %s3545_s1 = inlined_call_operand.vmem [shape: bf16[8,8,128], index: 1, kind: input, shape index: {}]   ;;  %s3546_s2 = inlined_call_operand.vmem [shape: s32[8,1], index: 2, kind: input, shape index: {}]   ;;  %s3547_s6 = inlined_call_operand.vmem [shape: bf16[128,512], index: 6, kind: input, shape index: {}]   ;;  %s3548_s8 = inlined_call_operand.vmem [shape: bf16[128,128], index: 8, kind: input, shape index: {}]   ;;  %s3549_s9 = inlined_call_operand.vmem [shape: bf16[128,128], index: 9, kind: input, shape index: {}]   ;;  %s3550_s10 = inlined_call_operand.vmem [shape: f32[1,128], index: 10, kind: input, shape index: {}]   ;;  %s3551_s11 = inlined_call_operand.vmem [shape: bf16[128,128], index: 11, kind: input, shape index: {}]   ;;  %s3552_s12 = inlined_call_operand.vmem [shape: f32[1,128], index: 12, kind: input, shape index: {}]   ;;  %s3553_s13 = inlined_call_operand.vmem [shape: f32[8,128], index: 13, kind: output, shape index: {}]   ;;  %s3554_s3 = inlined_call_operand.vmem [shape: bf16[128,128], index: 3, kind: input, shape index: {}]   ;;  %s3555_s0 = inlined_call_operand.vmem [shape: bf16[8,128], index: 0, kind: input, shape index: {}]   ;;  %s3556_s7 = inlined_call_operand.vmem [shape: f32[1,512], index: 7, kind: input, shape index: {}]   ;;  %s3557_s5 = inlined_call_operand.vmem [shape: bf16[128,512], index: 5, kind: input, shape index: {}]   ;;  %s3558_s4 = inlined_call_operand.vmem [shape: f32[1,128], index: 4, kind: input, shape index: {}]  }
   0x1   :  { %2093 = vmatprep.subr.bf16.mxu0 %v2387_v0  ;;  %v2185_v1 = vld [vmem:[%s3554_s3] sm:$0xff]   ;;  %2109 = vmatprep.mubr.msk.bf16.mxu0 %vm2388_vm0, %v2387_v0  ;;  %v2186_v2 = vld [vmem:[%s3554_s3 + $0x8] sm:$0xff]   ;;  %v2187_v3 = vld [vmem:[%s3554_s3 + $0x10] sm:$0xff]  }
   0x2   :  { %2094 = vmatpush3.bf16.msra.mxu0 %v2185_v1  ;;  %v2188_v4 = vld [vmem:[%s3554_s3 + $0x18] sm:$0xff]   ;;  %v2189_v5 = vld [vmem:[%s3554_s3 + $0x20] sm:$0xff]   ;;  %v2190_v6 = vld [vmem:[%s3554_s3 + $0x28] sm:$0xff]   ;;  %v192_v11 = vshrl.u32 %v191_v10, 7 }
   0x3   :  { %2095 = vmatprep.subr.bf16.mxu0 %v2387_v0  ;;  %v2191_v7 = vld [vmem:[%s3554_s3 + $0x30] sm:$0xff]   ;;  %v2192_v8 = vld [vmem:[%s3554_s3 + $0x38] sm:$0xff]   ;;  %v45_v9 = vld [vmem:[%s3555_s0] sm:$0xf] }
   0x4   :  { %v193_v12 = vsub.s32 0, %v192_v11  ;;  %v197_v13 = vsub.s32 1, %v192_v11  ;;  %v201_v14 = vsub.s32 2, %v192_v11  ;;  %v205_v15 = vsub.s32 3, %v192_v11  ;;  %v189_v16 = vld [vmem:[%s3556_s7] sm:$0xf] }
   0x5   :  { %v2504_v17 = vld [vmem:[%s3557_s5] sm:$0xff]  ;;  %v2509_v18 = vld [vmem:[%s3557_s5 + $0x8] sm:$0xff]  ;;  %v2514_v19 = vld [vmem:[%s3557_s5 + $0x10] sm:$0xff]  ;;  %s2674_s7 = smov 0  }
   0x6   :  { %2096 = vmatpush3.bf16.msra.mxu0 %v2186_v2  ;;  %v2516_v20 = vrot.slane %v189_v16, %v193_v12  ;;  %v2518_v21 = vrot.slane %v189_v16, %v197_v13  ;;  %v2520_v22 = vrot.slane %v189_v16, %v201_v14  ;;  %v2522_v23 = vrot.slane %v189_v16, %v205_v15  ;;  %v2527_v24 = vld [vmem:[%s3557_s5 + $0x18] sm:$0xff]  ;;  %v2532_v25 = vld [vmem:[%s3557_s5 + $0x20] sm:$0xff]  ;;  %v2537_v26 = vld [vmem:[%s3557_s5 + $0x28] sm:$0xff] }
   0x7   :  { %2097 = vmatprep.subr.bf16.mxu0 %v2387_v0  ;;  %v2542_v27 = vld [vmem:[%s3557_s5 + $0x30] sm:$0xff]  ;;  %v2547_v28 = vld [vmem:[%s3557_s5 + $0x38] sm:$0xff]  ;;  %v2552_v29 = vld [vmem:[%s3557_s5 + $0x40] sm:$0xff] }
   0x8   :  { %v2557_v30 = vld [vmem:[%s3557_s5 + $0x48] sm:$0xff]  ;;  %v2562_v31 = vld [vmem:[%s3557_s5 + $0x50] sm:$0xff]  ;;  %v2567_v32 = vld [vmem:[%s3557_s5 + $0x58] sm:$0xff] }
   0x9   :  { %v2572_v33 = vld [vmem:[%s3557_s5 + $0x60] sm:$0xff]  ;;  %v2577_v34 = vld [vmem:[%s3557_s5 + $0x68] sm:$0xff]  ;;  %v2582_v35 = vld [vmem:[%s3557_s5 + $0x70] sm:$0xff] }
   0xa   :  { %2098 = vmatpush3.bf16.msra.mxu0 %v2187_v3  ;;  %v2587_v36 = vld [vmem:[%s3557_s5 + $0x78] sm:$0xff]  ;;  %v2592_v37 = vld [vmem:[%s3557_s5 + $0x80] sm:$0xff]  ;;  %v2597_v38 = vld [vmem:[%s3557_s5 + $0x88] sm:$0xff] }
   0xb   :  { %2099 = vmatprep.subr.bf16.mxu0 %v2387_v0  ;;  %v2602_v39 = vld [vmem:[%s3557_s5 + $0x90] sm:$0xff]  ;;  %v2607_v40 = vld [vmem:[%s3557_s5 + $0x98] sm:$0xff]  ;;  %v2612_v41 = vld [vmem:[%s3557_s5 + $0xa0] sm:$0xff] }
   0xc   :  { %v2617_v42 = vld [vmem:[%s3557_s5 + $0xa8] sm:$0xff]  ;;  %v2622_v43 = vld [vmem:[%s3557_s5 + $0xb0] sm:$0xff]  ;;  %v2627_v44 = vld [vmem:[%s3557_s5 + $0xb8] sm:$0xff] }
   0xd   :  { %v2632_v45 = vld [vmem:[%s3557_s5 + $0xc0] sm:$0xff]  ;;  %v2637_v46 = vld [vmem:[%s3557_s5 + $0xc8] sm:$0xff]  ;;  %v2642_v47 = vld [vmem:[%s3557_s5 + $0xd0] sm:$0xff] }
   0xe   :  { %2100 = vmatpush3.bf16.msra.mxu0 %v2188_v4  ;;  %v2647_v48 = vld [vmem:[%s3557_s5 + $0xd8] sm:$0xff]  ;;  %v2652_v49 = vld [vmem:[%s3557_s5 + $0xe0] sm:$0xff]  ;;  %v2657_v50 = vld [vmem:[%s3557_s5 + $0xe8] sm:$0xff] }
   0xf   :  { %2101 = vmatprep.subr.bf16.mxu0 %v2387_v0  ;;  %v2662_v51 = vld [vmem:[%s3557_s5 + $0xf0] sm:$0xff]  ;;  %v2667_v52 = vld [vmem:[%s3557_s5 + $0xf8] sm:$0xff]  ;;  %v1948_v53 = vld [vmem:[%s3558_s4] ss:$0 sm:$0xff] }
  0x12   :  { %2102 = vmatpush3.bf16.msra.mxu0 %v2189_v5 }
  0x13   :  { %2103 = vmatprep.subr.bf16.mxu0 %v2387_v0 }
  0x16   :  { %2104 = vmatpush3.bf16.msra.mxu0 %v2190_v6 }
  0x17   :  { %2105 = vmatprep.subr.bf16.mxu0 %v2387_v0 }
  0x1a   :  { %2106 = vmatpush3.bf16.msra.mxu0 %v2191_v7 }
  0x1b   :  { %2107 = vmatprep.subr.bf16.mxu0 %v2387_v0 }
  0x1e   :  { %2108 = vmatpush3.bf16.msra.mxu0 %v2192_v8 }
  0x21   :  { %2110 = vmatmul.mubr.bf16.vlgmr.msra.gmra.mrb[0].mxu0 %v45_v9 }
  0xf4   :  { %v151_v54 = vpop.f32.mrb[0].mxu0 }
  0xf5   :  { %v2672_v55 = vadd.f32 %v1948_v53, %v151_v54  ;;  %v2111_v56 = vpop.f32.mrb[1].mxu0 }
  0xf6   :  { %v154_v57 = vpop.f32.mrb[2].mxu0 }
  0xf7   :  { %v2112_v58 = vpop.f32.mrb[3].mxu0 }
  0xf8 LB: > { %v1959_v59 = vcombine.high %v2504_v17, %v2514_v19  ;;  %v1961_v60 = vcombine.high %v2509_v18, %v2527_v24  ;;  %v1958_v61 = vcombine.low %v2504_v17, %v2514_v19  ;;  %v1960_v62 = vcombine.low %v2509_v18, %v2527_v24  ;;  %s1957_s4 = sshll.u32 %s2385_s7, 2  ;;  %s2056_s17 = sshll.u32 %s2385_s7, 5  ;;  %s2385_s7 = sphi %s2674_s7, %s216_s7  }
  0xf9   : > { %v1963_v63 = vcombine.high %v2532_v25, %v2542_v27  ;;  %v1965_v1 = vcombine.high %v2537_v26, %v2547_v28  ;;  %v1962_v2 = vcombine.low %v2532_v25, %v2542_v27  ;;  %v1964_v3 = vcombine.low %v2537_v26, %v2547_v28  ;;  %s218_s16 = scalar_lea.vmem %s3545_s1, %s1957_s4  ;;  %s464_s18 = scalar_lea.vmem [#allocation2], %s2056_s17 }
  0xfa   : > { %380 = vmatprep.subr.bf16.mxu0 %v1959_v59  ;;  %421 = vmatprep.subr.bf16.mxu1 %v1961_v60  ;;  %v1967_v4 = vcombine.high %v2552_v29, %v2562_v31  ;;  %v1969_v5 = vcombine.high %v2557_v30, %v2567_v32  ;;  %v2389_v6 = vmov 0   ;;  %v1966_v7 = vcombine.low %v2552_v29, %v2562_v31  ;;  %s216_s7 = sadd.s32 1, %s2385_s7  }
  0xfb   : > { %381 = vmatpush1.bf16.msra.mxu0 %v1958_v61  ;;  %422 = vmatpush1.bf16.msra.mxu1 %v1960_v62  ;;  %v1968_v8 = vcombine.low %v2557_v30, %v2567_v32  ;;  %v1971_v9 = vcombine.high %v2572_v33, %v2582_v35  ;;  %v1973_v10 = vcombine.high %v2577_v34, %v2587_v36  ;;  %p213_p0 = scmp.ge.s32.totalorder %s216_s7, 8  }
  0xfc   : > { %382 = vmatprep.subr.bf16.mxu0 %v1963_v63  ;;  %423 = vmatprep.subr.bf16.mxu1 %v1965_v1  ;;  %v1970_v11 = vcombine.low %v2572_v33, %v2582_v35  ;;  %v1972_v12 = vcombine.low %v2577_v34, %v2587_v36  ;;  %v1975_v13 = vcombine.high %v2592_v37, %v2602_v39  ;;  %v2771_v17 = vld [vmem:[%s3547_s6 + $0x24] ss:$16 sps:$4 sm:$0xff] (%p213_p0)   ;;  %v2778_v18 = vld [vmem:[%s3547_s6 + $0xc] ss:$16 sps:$4 sm:$0xff] (%p213_p0)   ;;  %v2783_v19 = vld [vmem:[%s3547_s6 + $0x20] ss:$16 sps:$4 sm:$0xff] (%p213_p0)  }
  0xfd   : > { %412 = vmatprep.mubr.bf16.mxu0 %v2389_v6  ;;  %453 = vmatprep.mubr.bf16.mxu1 %v2389_v6  ;;  %v1977_v14 = vcombine.high %v2597_v38, %v2607_v40  ;;  %v1974_v15 = vcombine.low %v2592_v37, %v2602_v39  ;;  %v1976_v16 = vcombine.low %v2597_v38, %v2607_v40  ;;  %v2814_v24 = vld [vmem:[%s3547_s6 + $0x40] ss:$16 sps:$4 sm:$0xff] (%p213_p0)   ;;  %v2820_v25 = vld [vmem:[%s3547_s6 + $0x64] ss:$16 sps:$4 sm:$0xff] (%p213_p0)   ;;  %v2825_v26 = vld [vmem:[%s3547_s6 + $0x4c] ss:$16 sps:$4 sm:$0xff] (%p213_p0)  }
  0xfe   : > { %v1979_v53 = vcombine.high %v2612_v41, %v2622_v43  ;;  %v1981_v54 = vcombine.high %v2617_v42, %v2627_v44  ;;  %v1978_v56 = vcombine.low %v2612_v41, %v2622_v43  ;;  %v1980_v57 = vcombine.low %v2617_v42, %v2627_v44  ;;  %v2831_v27 = vld [vmem:[%s3547_s6 + $0x48] ss:$16 sps:$4 sm:$0xff] (%p213_p0)   ;;  %v2838_v28 = vld [vmem:[%s3547_s6 + $0x60] ss:$16 sps:$4 sm:$0xff] (%p213_p0)   ;;  %v2843_v29 = vld [vmem:[%s3547_s6 + $0x6c] ss:$16 sps:$4 sm:$0xff] (%p213_p0)  }
  0xff   : > { %383 = vmatpush1.bf16.msra.mxu0 %v1962_v2  ;;  %424 = vmatpush1.bf16.msra.mxu1 %v1964_v3  ;;  %v1983_v58 = vcombine.high %v2632_v45, %v2642_v47  ;;  %v1985_v59 = vcombine.high %v2637_v46, %v2647_v48  ;;  %v1982_v60 = vcombine.low %v2632_v45, %v2642_v47  ;;  %v219_v3 = vld [vmem:[%s218_s16] sm:$0xf]  ;;  %v2849_v30 = vld [vmem:[%s3547_s6 + $0x84] ss:$16 sps:$4 sm:$0xff] (%p213_p0)   ;;  %v2860_v32 = vld [vmem:[%s3547_s6 + $0x68] ss:$16 sps:$4 sm:$0xff] (%p213_p0)  }
 0x100   : > { %384 = vmatprep.subr.bf16.mxu0 %v1967_v4  ;;  %425 = vmatprep.subr.bf16.mxu1 %v1969_v5  ;;  %v1984_v61 = vcombine.low %v2637_v46, %v2647_v48  ;;  %v1987_v62 = vcombine.high %v2652_v49, %v2662_v51  ;;  %v1989_v63 = vcombine.high %v2657_v50, %v2667_v52  ;;  %v2855_v31 = vld [vmem:[%s3547_s6 + $0x80] ss:$16 sps:$4 sm:$0xff] (%p213_p0)   ;;  %v2867_v33 = vld [vmem:[%s3547_s6 + $0x8c] ss:$16 sps:$4 sm:$0xff] (%p213_p0)   ;;  %v2873_v34 = vld [vmem:[%s3547_s6 + $0xa4] ss:$16 sps:$4 sm:$0xff] (%p213_p0)  }
 0x101   : > { %v1986_v1 = vcombine.low %v2652_v49, %v2662_v51  ;;  %v1988_v2 = vcombine.low %v2657_v50, %v2667_v52  ;;  %v2879_v35 = vld [vmem:[%s3547_s6 + $0x88] ss:$16 sps:$4 sm:$0xff] (%p213_p0)   ;;  %v2886_v36 = vld [vmem:[%s3547_s6 + $0xa0] ss:$16 sps:$4 sm:$0xff] (%p213_p0)   ;;  %v2891_v37 = vld [vmem:[%s3547_s6 + $0xac] ss:$16 sps:$4 sm:$0xff] (%p213_p0)  }
 0x102   :  { %v2897_v38 = vld [vmem:[%s3547_s6 + $0xc4] ss:$16 sps:$4 sm:$0xff] (%p213_p0)   ;;  %v2902_v39 = vld [vmem:[%s3547_s6 + $0xc0] ss:$16 sps:$4 sm:$0xff] (%p213_p0)   ;;  %v2907_v40 = vld [vmem:[%s3547_s6 + $0xa8] ss:$16 sps:$4 sm:$0xff] (%p213_p0)  }
 0x103   : > { %385 = vmatpush1.bf16.msra.mxu0 %v1966_v7  ;;  %426 = vmatpush1.bf16.msra.mxu1 %v1968_v8  ;;  %v2912_v41 = vld [vmem:[%s3547_s6 + $0xcc] ss:$16 sps:$4 sm:$0xff] (%p213_p0)   ;;  %v2917_v42 = vld [vmem:[%s3546_s2] sm:$0xff] (%p213_p0)  ;;  %v2939_v48 = vld [vmem:[%s3547_s6 + $0xc8] ss:$16 sps:$4 sm:$0xff] (%p213_p0)  }
 0x104   : > { %386 = vmatprep.subr.bf16.mxu0 %v1971_v9  ;;  %427 = vmatprep.subr.bf16.mxu1 %v1973_v10  ;;  %v2923_v43 = vld [vmem:[%s3547_s6 + $0xe4] ss:$16 sps:$4 sm:$0xff] (%p213_p0)   ;;  %vm770_vm1 = vcmp.gt.s32.totalorder (%p213_p0), %v2917_v42, 0  ;;  %vm888_vm2 = vcmp.gt.s32.totalorder (%p213_p0), %v2917_v42, 1  ;;  %vm1242_vm3 = vcmp.gt.s32.totalorder (%p213_p0), %v2917_v42, 4  ;;  %vm1478_vm4 = vcmp.gt.s32.totalorder (%p213_p0), %v2917_v42, 6 }
 0x105   :  { %v2944_v49 = vld [vmem:[%s3547_s6 + $0xe0] ss:$16 sps:$4 sm:$0xff] (%p213_p0)   ;;  %v2949_v50 = vld [vmem:[%s3547_s6 + $0xec] ss:$16 sps:$4 sm:$0xff] (%p213_p0)   ;;  %v2958_v51 = vld [vmem:[%s3547_s6 + $0xe8] ss:$16 sps:$4 sm:$0xff] (%p213_p0)  }
 0x106   :  { %vm1006_vm7 = vcmp.gt.s32.totalorder (%p213_p0), %v2917_v42, 2  ;;  %vm1124_vm8 = vcmp.gt.s32.totalorder (%p213_p0), %v2917_v42, 3  ;;  %vm1360_vm9 = vcmp.gt.s32.totalorder (%p213_p0), %v2917_v42, 5  ;;  %vm1596_vm10 = vcmp.gt.s32.totalorder (%p213_p0), %v2917_v42, 7 }
 0x107   : > { %387 = vmatpush1.bf16.msra.mxu0 %v1970_v11  ;;  %428 = vmatpush1.bf16.msra.mxu1 %v1972_v12 }
 0x108   : > { %388 = vmatprep.subr.bf16.mxu0 %v1975_v13  ;;  %429 = vmatprep.subr.bf16.mxu1 %v1977_v14 }
 0x10b   : > { %389 = vmatpush1.bf16.msra.mxu0 %v1974_v15  ;;  %430 = vmatpush1.bf16.msra.mxu1 %v1976_v16  ;;  %v2758_v16 = vld [vmem:[%s3547_s6 + $0x4] ss:$16 sps:$4 sm:$0xff] (%p213_p0)  }
 0x10c   : > { %390 = vmatprep.subr.bf16.mxu0 %v1979_v53  ;;  %431 = vmatprep.subr.bf16.mxu1 %v1981_v54  ;;  %v2763_v53 = vld [vmem:[%s3547_s6] ss:$16 sps:$4 sm:$0xff] (%p213_p0)   ;;  %v2390_v54 = vmov (%p213_p0), 0  }
 0x10d   :  { %2193 = vset.pattern.permute.xlu0 (%p213_p0), %v2390_v54  ;;  %2194 = vset.pattern.permute.xlu1 (%p213_p0), %v2390_v54  ;;  %v771_v44 = vsel (%p213_p0), %vm770_vm1, 1, %v2390_v54  ;;  %v889_v45 = vsel (%p213_p0), %vm888_vm2, 1, %v2390_v54  ;;  %v1243_v46 = vsel (%p213_p0), %vm1242_vm3, 1, %v2390_v54  ;;  %v1479_v47 = vsel (%p213_p0), %vm1478_vm4, 1, %v2390_v54 }
 0x10e   :  { %773 = vperm.xlu0 (%p213_p0), %2193, %v771_v44  }
 0x10f   : > { %391 = vmatpush1.bf16.msra.mxu0 %v1978_v56  ;;  %432 = vmatpush1.bf16.msra.mxu1 %v1980_v57 }
 0x110   : > { %392 = vmatprep.subr.bf16.mxu0 %v1983_v58  ;;  %433 = vmatprep.subr.bf16.mxu1 %v1985_v59 }
 0x112   :  { %891 = vperm.xlu0 (%p213_p0), %2193, %v889_v45  }
 0x113   : > { %393 = vmatpush1.bf16.msra.mxu0 %v1982_v60  ;;  %434 = vmatpush1.bf16.msra.mxu1 %v1984_v61 }
 0x114   : > { %394 = vmatprep.subr.bf16.mxu0 %v1987_v62  ;;  %435 = vmatprep.subr.bf16.mxu1 %v1989_v63 }
 0x116   :  { %1245 = vperm.xlu0 (%p213_p0), %2193, %v1243_v46  }
 0x117   : > { %395 = vmatpush1.bf16.msra.mxu0 %v1986_v1  ;;  %436 = vmatpush1.bf16.msra.mxu1 %v1988_v2 }
 0x118   :  { %666 = vmatprep.subr.bf16.mxu0 (%p213_p0), %v2758_v16  ;;  %707 = vmatprep.subr.bf16.mxu1 (%p213_p0), %v2778_v18 }
 0x11a   : > { %413 = vmatmul.mubr.bf16.vlgmr.msra.gmra.mrb[0].mxu0 %v219_v3  ;;  %454 = vmatmul.mubr.bf16.vlgmr.msra.gmra.mrb[0].mxu1 %v219_v3 }
 0x11b   :  { %698 = vmatprep.mubr.bf16.mxu0 (%p213_p0), %v2390_v54  ;;  %739 = vmatprep.mubr.bf16.mxu1 (%p213_p0), %v2390_v54 }
 0x11c   :  { %667 = vmatpush1.bf16.msra.mxu0 (%p213_p0), %v2763_v53  ;;  %1481 = vperm.xlu0 (%p213_p0), %2193, %v1479_v47  }
 0x11d   :  { %668 = vmatprep.subr.bf16.mxu0 (%p213_p0), %v2771_v17 }
 0x120   :  { %669 = vmatpush1.bf16.msra.mxu0 (%p213_p0), %v2783_v19 }
 0x1eb   :  { %215 = sbr.rel (!%p213_p0) target bundleno = 248 (0xf8), region = 88 }
 0x1ed   : > { %v414_v4 = vpop.f32.mrb[0].mxu0  ;;  %v455_v5 = vpop.f32.mrb[0].mxu1 }
 0x1ee   : > { %v415_v6 = vadd.f32 %v414_v4, %v2516_v20  ;;  %v456_v7 = vadd.f32 %v455_v5, %v2520_v22  ;;  %v416_v8 = vpop.f32.mrb[1].mxu0  ;;  %v457_v9 = vpop.f32.mrb[1].mxu1  ;;  %v2788_v20 = vld [vmem:[%s3547_s6 + $0x8] ss:$16 sps:$4 sm:$0xff] (%p213_p0)   ;;  %v2801_v22 = vld [vmem:[%s3547_s6 + $0x2c] ss:$16 sps:$4 sm:$0xff] (%p213_p0)  }
 0x1ef   : > { %v417_v10 = vadd.f32 %v416_v8, %v2518_v21  ;;  %v458_v11 = vadd.f32 %v457_v9, %v2522_v23  ;;  %v418_v12 = vpop.f32.mrb[2].mxu0  ;;  %v459_v13 = vpop.f32.mrb[2].mxu1  ;;  %v2795_v21 = vld [vmem:[%s3547_s6 + $0x44] ss:$16 sps:$4 sm:$0xff] (%p213_p0)   ;;  %708 = vmatpush1.bf16.msra.mxu1 (%p213_p0), %v2788_v20  ;;  %v2807_v23 = vld [vmem:[%s3547_s6 + $0x28] ss:$16 sps:$4 sm:$0xff] (%p213_p0)  }
 0x1f0   : > { %465 = vst [vmem:[%s464_s18] sm:$0xff] %v415_v6  ;;  %467 = vst [vmem:[%s464_s18 + $0x10] sm:$0xff] %v456_v7  ;;  %v419_v14 = vpop.f32.mrb[3].mxu0  ;;  %v460_v15 = vpop.f32.mrb[3].mxu1  ;;  %709 = vmatprep.subr.bf16.mxu1 (%p213_p0), %v2801_v22  ;;  %670 = vmatprep.subr.bf16.mxu0 (%p213_p0), %v2795_v21 }
 0x1f1   : > { %466 = vst [vmem:[%s464_s18 + $0x8] sm:$0xff] %v417_v10  ;;  %468 = vst [vmem:[%s464_s18 + $0x18] sm:$0xff] %v458_v11  ;;  %671 = vmatpush1.bf16.msra.mxu0 (%p213_p0), %v2814_v24 }
 0x1f2   :  { %672 = vmatprep.subr.bf16.mxu0 %v2820_v25 }
 0x1f3   :  { %710 = vmatpush1.bf16.msra.mxu1 %v2807_v23 }
 0x1f4   :  { %711 = vmatprep.subr.bf16.mxu1 %v2825_v26 }
 0x1f5   :  { %673 = vmatpush1.bf16.msra.mxu0 %v2838_v28 }
 0x1f6   :  { %674 = vmatprep.subr.bf16.mxu0 %v2849_v30 }
 0x1f7   :  { %712 = vmatpush1.bf16.msra.mxu1 %v2831_v27 }
 0x1f8   :  { %713 = vmatprep.subr.bf16.mxu1 %v2843_v29  ;;  %v502_v52 = vld [vmem:[#allocation2] sm:$0xff]  ;;  %v503_v56 = vld [vmem:[#allocation2 + $0x8] sm:$0xff]  ;;  %v504_v60 = vld [vmem:[#allocation2 + $0x10] sm:$0xff] }
 0x1f9   :  { %675 = vmatpush1.bf16.msra.mxu0 %v2855_v31  ;;  %v505_v7 = vld [vmem:[#allocation2 + $0x18] sm:$0xff] }
 0x1fa   :  { %676 = vmatprep.subr.bf16.mxu0 %v2873_v34 }
 0x1fb   :  { %714 = vmatpush1.bf16.msra.mxu1 %v2860_v32 }
 0x1fc   :  { %715 = vmatprep.subr.bf16.mxu1 %v2867_v33 }
 0x1fd   :  { %677 = vmatpush1.bf16.msra.mxu0 %v2886_v36 }
 0x1fe   :  { %678 = vmatprep.subr.bf16.mxu0 %v2897_v38 }
 0x1ff   :  { %716 = vmatpush1.bf16.msra.mxu1 %v2879_v35 }
 0x200   :  { %717 = vmatprep.subr.bf16.mxu1 %v2891_v37 }
 0x201   :  { %679 = vmatpush1.bf16.msra.mxu0 %v2902_v39 }
 0x202   :  { %680 = vmatprep.subr.bf16.mxu0 %v2923_v43 }
 0x203   :  { %718 = vmatpush1.bf16.msra.mxu1 %v2907_v40 }
 0x204   :  { %719 = vmatprep.subr.bf16.mxu1 %v2912_v41 }
 0x205   :  { %681 = vmatpush1.bf16.msra.mxu0 %v2944_v49 }
 0x206   :  { %784 = vmatprep.subr.bf16.mxu0 %v2758_v16 }
 0x207   :  { %720 = vmatpush1.bf16.msra.mxu1 %v2939_v48 }
 0x208   :  { %721 = vmatprep.subr.bf16.mxu1 %v2949_v50  ;;  %699 = vmatmul.mubr.bf16.vlgmr.msra.gmra.mrb[0].mxu0 %v2390_v54 }
 0x209   :  { %785 = vmatpush1.bf16.msra.mxu0 %v2763_v53  ;;  %816 = vmatprep.mubr.bf16.mxu0 %v2390_v54 }
 0x20a   :  { %786 = vmatprep.subr.bf16.mxu0 %v2771_v17 }
 0x20b   :  { %722 = vmatpush1.bf16.msra.mxu1 %v2958_v51 }
 0x20c   :  { %825 = vmatprep.subr.bf16.mxu1 %v2778_v18 }
 0x20d   :  { %787 = vmatpush1.bf16.msra.mxu0 %v2783_v19 }
 0x20e   :  { %740 = vmatmul.mubr.bf16.vlgmr.msra.gmra.mrb[0].mxu1 %v2390_v54  ;;  %788 = vmatprep.subr.bf16.mxu0 %v2795_v21 }
 0x20f   :  { %826 = vmatpush1.bf16.msra.mxu1 %v2788_v20  ;;  %857 = vmatprep.mubr.bf16.mxu1 %v2390_v54 }
 0x210   :  { %827 = vmatprep.subr.bf16.mxu1 %v2801_v22 }
 0x211   :  { %789 = vmatpush1.bf16.msra.mxu0 %v2814_v24 }
 0x212   :  { %790 = vmatprep.subr.bf16.mxu0 %v2820_v25 }
 0x213   :  { %828 = vmatpush1.bf16.msra.mxu1 %v2807_v23 }
 0x214   :  { %829 = vmatprep.subr.bf16.mxu1 %v2825_v26 }
 0x215   :  { %791 = vmatpush1.bf16.msra.mxu0 %v2838_v28 }
 0x216   :  { %792 = vmatprep.subr.bf16.mxu0 %v2849_v30 }
 0x217   :  { %830 = vmatpush1.bf16.msra.mxu1 %v2831_v27 }
 0x218   :  { %831 = vmatprep.subr.bf16.mxu1 %v2843_v29 }
 0x219   :  { %793 = vmatpush1.bf16.msra.mxu0 %v2855_v31 }
 0x21a   :  { %794 = vmatprep.subr.bf16.mxu0 %v2873_v34 }
 0x21b   :  { %832 = vmatpush1.bf16.msra.mxu1 %v2860_v32 }
 0x21c   :  { %833 = vmatprep.subr.bf16.mxu1 %v2867_v33 }
 0x21d   :  { %795 = vmatpush1.bf16.msra.mxu0 %v2886_v36 }
 0x21e   :  { %796 = vmatprep.subr.bf16.mxu0 %v2897_v38 }
 0x21f   :  { %834 = vmatpush1.bf16.msra.mxu1 %v2879_v35 }
 0x220   :  { %835 = vmatprep.subr.bf16.mxu1 %v2891_v37 }
 0x221   :  { %797 = vmatpush1.bf16.msra.mxu0 %v2902_v39 }
 0x222   :  { %798 = vmatprep.subr.bf16.mxu0 %v2923_v43 }
 0x223   :  { %836 = vmatpush1.bf16.msra.mxu1 %v2907_v40 }
 0x224   :  { %837 = vmatprep.subr.bf16.mxu1 %v2912_v41 }
 0x225   :  { %799 = vmatpush1.bf16.msra.mxu0 %v2944_v49 }
 0x226   :  { %902 = vmatprep.subr.bf16.mxu0 %v2758_v16 }
 0x227   :  { %838 = vmatpush1.bf16.msra.mxu1 %v2939_v48 }
 0x228   :  { %839 = vmatprep.subr.bf16.mxu1 %v2949_v50 }
 0x22b   :  { %840 = vmatpush1.bf16.msra.mxu1 %v2958_v51 }
 0x22c   :  { %943 = vmatprep.subr.bf16.mxu1 %v2778_v18 }
 0x2db   :  { %v700_v57 = vpop.f32.mrb[0].mxu0 }
 0x2dc   :  { %v748_v58 = vadd.f32 %v700_v57, %v502_v52  ;;  %v702_v59 = vpop.f32.mrb[1].mxu0 }
 0x2dd   :  { %v749_v61 = vadd.f32 %v702_v59, %v503_v56  ;;  %v704_v62 = vpop.f32.mrb[2].mxu0 }
 0x2de   :  { %v752_v63 = vmul.f32 0.5, %v748_v58  ;;  %v705_v1 = vpop.f32.mrb[3].mxu0  ;;  %v3005_v58 = vpop.permute.xlu0 %773 }
 0x2df   :  { %v756_v3 = vmul.f32 0.5, %v749_v61  ;;  %vm775_vm5 = vcmp.eq.s32.totalorder %v3005_v58, 1  ;;  %v1125_v1 = vsel %vm1124_vm8, 1, %v2390_v54  ;;  %v897_v58 = vld [vmem:[#allocation2 + $0x40] sm:$0xff] }
 0x2e0   :  { %2267 = vtanh.f32 %v752_v63  ;;  %vm2024_vm6 = vmpackc.low %vm775_vm5, %vm775_vm5  ;;  %v1007_v63 = vsel %vm1006_vm7, 1, %v2390_v54 }
 0x2e1   :  { %v741_v2 = vpop.f32.mrb[0].mxu1  ;;  %2269 = vtanh.f32 %v756_v3  ;;  %1009 = vperm.xlu1 %2194, %v1007_v63   ;;  %v1597_v3 = vsel %vm1596_vm10, 1, %v2390_v54 }
 0x2e2   :  { %v750_v4 = vadd.f32 %v741_v2, %v504_v60  ;;  %v743_v5 = vpop.f32.mrb[1].mxu1  ;;  %v1361_v2 = vsel %vm1360_vm9, 1, %v2390_v54 }
 0x2e3   :  { %v745_v6 = vpop.f32.mrb[2].mxu1  ;;  %v751_v9 = vadd.f32 %v743_v5, %v505_v7  ;;  %v780_v5 = vld [vmem:[#allocation2 + $0x28] sm:$0xff] }
 0x2e4   :  { %v746_v8 = vpop.f32.mrb[3].mxu1  ;;  %2271 = vtanh.f32 %v750_v4  ;;  %v779_v4 = vld [vmem:[#allocation2 + $0x20] sm:$0xff] }
 0x2e5   :  { %v761_v10 = vmul.f32 0.5, %v751_v9  ;;  %1127 = vperm.xlu1 %2194, %v1125_v1  }
 0x2e7   :  { %2273 = vtanh.f32 %v761_v10 }
 0x2e9   :  { %1363 = vperm.xlu1 %2194, %v1361_v2  }
 0x2ea   :  { %v2268_v11 = vpop.eup %2267 }
 0x2eb   :  { %v2270_v12 = vpop.eup %2269  ;;  %v754_v13 = vadd.f32 1.0, %v2268_v11  ;;  %v781_v11 = vld [vmem:[#allocation2 + $0x30] sm:$0xff] }
 0x2ec   :  { %v758_v15 = vadd.f32 1.0, %v2270_v12 }
 0x2ed   :  { %v755_v44 = vmul.f32 0.5, %v754_v13  ;;  %1599 = vperm.xlu1 %2194, %v1597_v3  }
 0x2ee   :  { %v2272_v14 = vpop.eup %2271  ;;  %v759_v45 = vmul.f32 0.5, %v758_v15 }
 0x2ef   :  { %v766_v46 = vmul.f32 %v2272_v14, %v755_v44 }
 0x2f0   :  { %v765_v47 = vmul.f32 0.0, %v759_v45 }
 0x2f1   :  { %v2274_v56 = vpop.eup %2273 }
 0x2f2   :  { %v3002_v52 = vadd.f32 %v766_v46, %v765_v47  ;;  %v763_v57 = vadd.f32 1.0, %v2274_v56  ;;  %v782_v47 = vld [vmem:[#allocation2 + $0x38] sm:$0xff] }
 0x2f4   :  { %2275 = vtanh.f32 %v3002_v52  ;;  %v764_v59 = vmul.f32 0.5, %v763_v57 }
 0x2fe   :  { %v2276_v60 = vpop.eup %2275 }
 0x2ff   :  { %v3007_v61 = vmul.f32 %v2276_v60, %v764_v59 }
 0x301   :  { %v2025_v62 = vpack.c.bf16 %v3007_v61, %v3007_v61 }
 0x303   :  { %2026 = vmatmul.mubr.msk.bf16.vlgmr.msra.gmra.mrb[4].mxu0 %vm2024_vm6, %v2025_v62  ;;  %2029 = vmatmul.mubr.msk.bf16.vlgmr.msra.gmra.mrb[4].mxu1 %vm2024_vm6, %v2025_v62 }
 0x304   :  { %903 = vmatpush1.bf16.msra.mxu0 %v2763_v53  ;;  %944 = vmatpush1.bf16.msra.mxu1 %v2788_v20 }
 0x305   :  { %904 = vmatprep.subr.bf16.mxu0 %v2771_v17  ;;  %945 = vmatprep.subr.bf16.mxu1 %v2801_v22 }
 0x306   :  { %934 = vmatprep.mubr.bf16.mxu0 %v2390_v54  ;;  %975 = vmatprep.mubr.bf16.mxu1 %v2390_v54 }
 0x308   :  { %905 = vmatpush1.bf16.msra.mxu0 %v2783_v19  ;;  %946 = vmatpush1.bf16.msra.mxu1 %v2807_v23 }
 0x309   :  { %906 = vmatprep.subr.bf16.mxu0 %v2795_v21  ;;  %947 = vmatprep.subr.bf16.mxu1 %v2825_v26 }
 0x30c   :  { %907 = vmatpush1.bf16.msra.mxu0 %v2814_v24  ;;  %948 = vmatpush1.bf16.msra.mxu1 %v2831_v27 }
 0x30d   :  { %908 = vmatprep.subr.bf16.mxu0 %v2820_v25  ;;  %949 = vmatprep.subr.bf16.mxu1 %v2843_v29 }
 0x310   :  { %909 = vmatpush1.bf16.msra.mxu0 %v2838_v28  ;;  %950 = vmatpush1.bf16.msra.mxu1 %v2860_v32 }
 0x311   :  { %910 = vmatprep.subr.bf16.mxu0 %v2849_v30  ;;  %951 = vmatprep.subr.bf16.mxu1 %v2867_v33 }
 0x314   :  { %911 = vmatpush1.bf16.msra.mxu0 %v2855_v31  ;;  %952 = vmatpush1.bf16.msra.mxu1 %v2879_v35 }
 0x315   :  { %912 = vmatprep.subr.bf16.mxu0 %v2873_v34  ;;  %953 = vmatprep.subr.bf16.mxu1 %v2891_v37 }
 0x318   :  { %913 = vmatpush1.bf16.msra.mxu0 %v2886_v36  ;;  %954 = vmatpush1.bf16.msra.mxu1 %v2907_v40 }
 0x319   :  { %914 = vmatprep.subr.bf16.mxu0 %v2897_v38  ;;  %955 = vmatprep.subr.bf16.mxu1 %v2912_v41 }
 0x31c   :  { %915 = vmatpush1.bf16.msra.mxu0 %v2902_v39  ;;  %956 = vmatpush1.bf16.msra.mxu1 %v2939_v48 }
 0x31d   :  { %916 = vmatprep.subr.bf16.mxu0 %v2923_v43  ;;  %957 = vmatprep.subr.bf16.mxu1 %v2949_v50 }
 0x320   :  { %917 = vmatpush1.bf16.msra.mxu0 %v2944_v49  ;;  %958 = vmatpush1.bf16.msra.mxu1 %v2958_v51 }
 0x321   :  { %1020 = vmatprep.subr.bf16.mxu0 %v2758_v16  ;;  %1061 = vmatprep.subr.bf16.mxu1 %v2778_v18 }
 0x3d6   :  { %v818_v6 = vpop.f32.mrb[4].mxu0  ;;  %v859_v7 = vpop.f32.mrb[4].mxu1 }
 0x3d7   :  { %v866_v8 = vadd.f32 %v818_v6, %v779_v4  ;;  %v820_v9 = vpop.f32.mrb[5].mxu0  ;;  %v861_v10 = vpop.f32.mrb[5].mxu1  ;;  %v868_v42 = vadd.f32 %v859_v7, %v781_v11  ;;  %v777_v4 = vsel %vm775_vm5, %v3002_v52, 0.0 }
 0x3d8   :  { %v867_v12 = vadd.f32 %v820_v9, %v780_v5  ;;  %v822_v13 = vpop.f32.mrb[6].mxu0  ;;  %v863_v14 = vpop.f32.mrb[6].mxu1  ;;  %v869_v56 = vadd.f32 %v861_v10, %v782_v47 }
 0x3d9   :  { %v870_v15 = vmul.f32 0.5, %v866_v8  ;;  %v823_v44 = vpop.f32.mrb[7].mxu0  ;;  %v864_v45 = vpop.f32.mrb[7].mxu1 }
 0x3da   :  { %v874_v46 = vmul.f32 0.5, %v867_v12  ;;  %v879_v57 = vmul.f32 0.5, %v869_v56  ;;  %v892_v7 = vpop.permute.xlu0 %891 }
 0x3db   :  { %2277 = vtanh.f32 %v870_v15  ;;  %vm893_vm11 = vcmp.eq.s32.totalorder %v892_v7, 1  ;;  %v776_v15 = vsel %vm775_vm5, %v3007_v61, 0.0  ;;  %v898_v61 = vld [vmem:[#allocation2 + $0x48] sm:$0xff] }
 0x3dc   :  { %2279 = vtanh.f32 %v874_v46 }
 0x3dd   :  { %2281 = vtanh.f32 %v868_v42 }
 0x3de   :  { %2283 = vtanh.f32 %v879_v57  ;;  %v899_v57 = vld [vmem:[#allocation2 + $0x50] sm:$0xff] }
 0x3e5   :  { %v2278_v59 = vpop.eup %2277 }
 0x3e6   :  { %v2280_v60 = vpop.eup %2279  ;;  %v872_v62 = vadd.f32 1.0, %v2278_v59 }
 0x3e7   :  { %v876_v63 = vadd.f32 1.0, %v2280_v60  ;;  %v2282_v2 = vpop.eup %2281 }
 0x3e8   :  { %v873_v1 = vmul.f32 0.5, %v872_v62  ;;  %v2284_v10 = vpop.eup %2283 }
 0x3e9   :  { %v877_v3 = vmul.f32 0.5, %v876_v63  ;;  %v881_v11 = vadd.f32 1.0, %v2284_v10 }
 0x3ea   :  { %v884_v5 = vmul.f32 %v2282_v2, %v873_v1 }
 0x3eb   :  { %v883_v6 = vmul.f32 %v877_v3, %v777_v4  ;;  %v882_v12 = vmul.f32 0.5, %v881_v11 }
 0x3ed   :  { %v885_v8 = vadd.f32 %v884_v5, %v883_v6  ;;  %v900_v5 = vld [vmem:[#allocation2 + $0x58] sm:$0xff] }
 0x3ef   :  { %2285 = vtanh.f32 %v885_v8  ;;  %v3060_v9 = vsel %vm893_vm11, %v885_v8, %v777_v4 }
 0x3f9   :  { %v2286_v13 = vpop.eup %2285 }
 0x3fa   :  { %v887_v14 = vmul.f32 %v2286_v13, %v882_v12 }
 0x3fc   :  { %v3065_v44 = vsel %vm893_vm11, %v887_v14, %v776_v15 }
 0x3fd   :  { %v901_v52 = vpack.c.bf16 %v3065_v44, %v3065_v44 }
 0x3ff   :  { %935 = vmatmul.mubr.bf16.vlgmr.msra.gmra.mrb[8].mxu0 %v901_v52  ;;  %976 = vmatmul.mubr.bf16.vlgmr.msra.gmra.mrb[8].mxu1 %v901_v52  ;;  %v1010_v52 = vpop.permute.xlu1 %1009 }
 0x400   :  { %1021 = vmatpush1.bf16.msra.mxu0 %v2763_v53  ;;  %1062 = vmatpush1.bf16.msra.mxu1 %v2788_v20  ;;  %vm1011_vm12 = vcmp.eq.s32.totalorder %v1010_v52, 1 }
 0x401   :  { %1022 = vmatprep.subr.bf16.mxu0 %v2771_v17  ;;  %1063 = vmatprep.subr.bf16.mxu1 %v2801_v22 }
 0x402   :  { %1052 = vmatprep.mubr.bf16.mxu0 %v2390_v54  ;;  %1093 = vmatprep.mubr.bf16.mxu1 %v2390_v54 }
 0x404   :  { %1023 = vmatpush1.bf16.msra.mxu0 %v2783_v19  ;;  %1064 = vmatpush1.bf16.msra.mxu1 %v2807_v23 }
 0x405   :  { %1024 = vmatprep.subr.bf16.mxu0 %v2795_v21  ;;  %1065 = vmatprep.subr.bf16.mxu1 %v2825_v26 }
 0x408   :  { %1025 = vmatpush1.bf16.msra.mxu0 %v2814_v24  ;;  %1066 = vmatpush1.bf16.msra.mxu1 %v2831_v27 }
 0x409   :  { %1026 = vmatprep.subr.bf16.mxu0 %v2820_v25  ;;  %1067 = vmatprep.subr.bf16.mxu1 %v2843_v29 }
 0x40c   :  { %1027 = vmatpush1.bf16.msra.mxu0 %v2838_v28  ;;  %1068 = vmatpush1.bf16.msra.mxu1 %v2860_v32 }
 0x40d   :  { %1028 = vmatprep.subr.bf16.mxu0 %v2849_v30  ;;  %1069 = vmatprep.subr.bf16.mxu1 %v2867_v33 }
 0x410   :  { %1029 = vmatpush1.bf16.msra.mxu0 %v2855_v31  ;;  %1070 = vmatpush1.bf16.msra.mxu1 %v2879_v35 }
 0x411   :  { %1030 = vmatprep.subr.bf16.mxu0 %v2873_v34  ;;  %1071 = vmatprep.subr.bf16.mxu1 %v2891_v37 }
 0x414   :  { %1031 = vmatpush1.bf16.msra.mxu0 %v2886_v36  ;;  %1072 = vmatpush1.bf16.msra.mxu1 %v2907_v40 }
 0x415   :  { %1032 = vmatprep.subr.bf16.mxu0 %v2897_v38  ;;  %1073 = vmatprep.subr.bf16.mxu1 %v2912_v41 }
 0x418   :  { %1033 = vmatpush1.bf16.msra.mxu0 %v2902_v39  ;;  %1074 = vmatpush1.bf16.msra.mxu1 %v2939_v48 }
 0x419   :  { %1034 = vmatprep.subr.bf16.mxu0 %v2923_v43  ;;  %1075 = vmatprep.subr.bf16.mxu1 %v2949_v50 }
 0x41c   :  { %1035 = vmatpush1.bf16.msra.mxu0 %v2944_v49  ;;  %1076 = vmatpush1.bf16.msra.mxu1 %v2958_v51 }
 0x41d   :  { %1138 = vmatprep.subr.bf16.mxu0 %v2758_v16  ;;  %1179 = vmatprep.subr.bf16.mxu1 %v2778_v18 }
 0x4d2   :  { %v936_v45 = vpop.f32.mrb[8].mxu0  ;;  %v977_v46 = vpop.f32.mrb[8].mxu1 }
 0x4d3   :  { %v984_v42 = vadd.f32 %v936_v45, %v897_v58  ;;  %v938_v47 = vpop.f32.mrb[9].mxu0  ;;  %v979_v56 = vpop.f32.mrb[9].mxu1  ;;  %v986_v4 = vadd.f32 %v977_v46, %v899_v57 }
 0x4d4   :  { %v985_v59 = vadd.f32 %v938_v47, %v898_v61  ;;  %v940_v60 = vpop.f32.mrb[10].mxu0  ;;  %v981_v62 = vpop.f32.mrb[10].mxu1  ;;  %v987_v6 = vadd.f32 %v979_v56, %v900_v5  ;;  %v1017_v5 = vld [vmem:[#allocation2 + $0x70] sm:$0xff] }
 0x4d5   :  { %v988_v63 = vmul.f32 0.5, %v984_v42  ;;  %v941_v1 = vpop.f32.mrb[11].mxu0  ;;  %v982_v2 = vpop.f32.mrb[11].mxu1 }
 0x4d6   :  { %v992_v3 = vmul.f32 0.5, %v985_v59  ;;  %v997_v7 = vmul.f32 0.5, %v987_v6 }
 0x4d7   :  { %2287 = vtanh.f32 %v988_v63 }
 0x4d8   :  { %2289 = vtanh.f32 %v992_v3 }
 0x4d9   :  { %2291 = vtanh.f32 %v986_v4 }
 0x4da   :  { %2293 = vtanh.f32 %v997_v7 }
 0x4e1   :  { %v2288_v8 = vpop.eup %2287 }
 0x4e2   :  { %v2290_v10 = vpop.eup %2289  ;;  %v990_v11 = vadd.f32 1.0, %v2288_v8 }
 0x4e3   :  { %v994_v12 = vadd.f32 1.0, %v2290_v10  ;;  %v2292_v14 = vpop.eup %2291 }
 0x4e4   :  { %v991_v13 = vmul.f32 0.5, %v990_v11  ;;  %v2294_v42 = vpop.eup %2293 }
 0x4e5   :  { %v995_v15 = vmul.f32 0.5, %v994_v12  ;;  %v999_v47 = vadd.f32 1.0, %v2294_v42 }
 0x4e6   :  { %v1002_v58 = vmul.f32 %v2292_v14, %v991_v13 }
 0x4e7   :  { %v1001_v61 = vmul.f32 %v995_v15, %v3060_v9  ;;  %v1000_v56 = vmul.f32 0.5, %v999_v47 }
 0x4e9   :  { %v1003_v45 = vadd.f32 %v1002_v58, %v1001_v61 }
 0x4eb   :  { %2295 = vtanh.f32 %v1003_v45  ;;  %v3105_v46 = vsel %vm1011_vm12, %v1003_v45, %v3060_v9  ;;  %v1015_v9 = vld [vmem:[#allocation2 + $0x60] sm:$0xff] }
 0x4f5   :  { %v2296_v57 = vpop.eup %2295 }
 0x4f6   :  { %v1005_v59 = vmul.f32 %v2296_v57, %v1000_v56 }
 0x4f8   :  { %v3108_v60 = vsel %vm1011_vm12, %v1005_v59, %v3065_v44  ;;  %v1016_v44 = vld [vmem:[#allocation2 + $0x68] sm:$0xff] }
 0x4f9   :  { %v1019_v62 = vpack.c.bf16 %v3108_v60, %v3108_v60 }
 0x4fb   :  { %1053 = vmatmul.mubr.bf16.vlgmr.msra.gmra.mrb[12].mxu0 %v1019_v62  ;;  %1094 = vmatmul.mubr.bf16.vlgmr.msra.gmra.mrb[12].mxu1 %v1019_v62  ;;  %v1128_v62 = vpop.permute.xlu1 %1127 }
 0x4fc   :  { %1139 = vmatpush1.bf16.msra.mxu0 %v2763_v53  ;;  %1180 = vmatpush1.bf16.msra.mxu1 %v2788_v20  ;;  %vm1129_vm13 = vcmp.eq.s32.totalorder %v1128_v62, 1  ;;  %v3255_v62 = vld [vmem:[%s3547_s6 + $0x4c] ss:$16 sps:$4 sm:$0xff]  }
 0x4fd   :  { %1140 = vmatprep.subr.bf16.mxu0 %v2771_v17  ;;  %1181 = vmatprep.subr.bf16.mxu1 %v2801_v22 }
 0x4fe   :  { %1170 = vmatprep.mubr.bf16.mxu0 %v2390_v54  ;;  %1211 = vmatprep.mubr.bf16.mxu1 %v2390_v54 }
 0x500   :  { %1141 = vmatpush1.bf16.msra.mxu0 %v2783_v19  ;;  %1182 = vmatpush1.bf16.msra.mxu1 %v2807_v23 }
 0x501   :  { %1142 = vmatprep.subr.bf16.mxu0 %v2795_v21  ;;  %1183 = vmatprep.subr.bf16.mxu1 %v2825_v26 }
 0x504   :  { %1143 = vmatpush1.bf16.msra.mxu0 %v2814_v24  ;;  %1184 = vmatpush1.bf16.msra.mxu1 %v2831_v27 }
 0x505   :  { %1144 = vmatprep.subr.bf16.mxu0 %v2820_v25  ;;  %1185 = vmatprep.subr.bf16.mxu1 %v2843_v29 }
 0x508   :  { %1145 = vmatpush1.bf16.msra.mxu0 %v2838_v28  ;;  %1186 = vmatpush1.bf16.msra.mxu1 %v2860_v32 }
 0x509   :  { %1146 = vmatprep.subr.bf16.mxu0 %v2849_v30  ;;  %1187 = vmatprep.subr.bf16.mxu1 %v2867_v33 }
 0x50c   :  { %1147 = vmatpush1.bf16.msra.mxu0 %v2855_v31  ;;  %1188 = vmatpush1.bf16.msra.mxu1 %v2879_v35 }
 0x50d   :  { %1148 = vmatprep.subr.bf16.mxu0 %v2873_v34  ;;  %1189 = vmatprep.subr.bf16.mxu1 %v2891_v37 }
 0x510   :  { %1149 = vmatpush1.bf16.msra.mxu0 %v2886_v36  ;;  %1190 = vmatpush1.bf16.msra.mxu1 %v2907_v40 }
 0x511   :  { %1150 = vmatprep.subr.bf16.mxu0 %v2897_v38  ;;  %1191 = vmatprep.subr.bf16.mxu1 %v2912_v41 }
 0x514   :  { %1151 = vmatpush1.bf16.msra.mxu0 %v2902_v39  ;;  %1192 = vmatpush1.bf16.msra.mxu1 %v2939_v48 }
 0x515   :  { %1152 = vmatprep.subr.bf16.mxu0 %v2923_v43  ;;  %1193 = vmatprep.subr.bf16.mxu1 %v2949_v50 }
 0x518   :  { %1153 = vmatpush1.bf16.msra.mxu0 %v2944_v49  ;;  %1194 = vmatpush1.bf16.msra.mxu1 %v2958_v51 }
 0x519   :  { %1256 = vmatprep.subr.bf16.mxu0 %v2758_v16  ;;  %1297 = vmatprep.subr.bf16.mxu1 %v2778_v18  ;;  %v1018_v16 = vld [vmem:[#allocation2 + $0x78] sm:$0xff] }
 0x5ce   :  { %v1054_v63 = vpop.f32.mrb[12].mxu0  ;;  %v1095_v1 = vpop.f32.mrb[12].mxu1 }
 0x5cf   :  { %v1102_v2 = vadd.f32 %v1054_v63, %v1015_v9  ;;  %v1056_v3 = vpop.f32.mrb[13].mxu0  ;;  %v1097_v4 = vpop.f32.mrb[13].mxu1  ;;  %v1104_v14 = vadd.f32 %v1095_v1, %v1017_v5 }
 0x5d0   :  { %v1103_v6 = vadd.f32 %v1056_v3, %v1016_v44  ;;  %v1058_v7 = vpop.f32.mrb[14].mxu0  ;;  %v1099_v8 = vpop.f32.mrb[14].mxu1  ;;  %v1105_v18 = vadd.f32 %v1097_v4, %v1018_v16 }
 0x5d1   :  { %v1106_v10 = vmul.f32 0.5, %v1102_v2  ;;  %v1059_v11 = vpop.f32.mrb[15].mxu0  ;;  %v1100_v12 = vpop.f32.mrb[15].mxu1 }
 0x5d2   :  { %v1110_v13 = vmul.f32 0.5, %v1103_v6  ;;  %v1115_v15 = vmul.f32 0.5, %v1105_v18 }
 0x5d3   :  { %2297 = vtanh.f32 %v1106_v10  ;;  %v1246_v10 = vpop.permute.xlu0 %1245 }
 0x5d4   :  { %2299 = vtanh.f32 %v1110_v13  ;;  %vm1247_vm14 = vcmp.eq.s32.totalorder %v1246_v10, 1 }
 0x5d5   :  { %2301 = vtanh.f32 %v1104_v14 }
 0x5d6   :  { %2303 = vtanh.f32 %v1115_v15 }
 0x5dd   :  { %v2298_v52 = vpop.eup %2297 }
 0x5de   :  { %v2300_v58 = vpop.eup %2299  ;;  %v1108_v61 = vadd.f32 1.0, %v2298_v52 }
 0x5df   :  { %v1112_v45 = vadd.f32 1.0, %v2300_v58  ;;  %v2302_v47 = vpop.eup %2301 }
 0x5e0   :  { %v1109_v42 = vmul.f32 0.5, %v1108_v61  ;;  %v2304_v63 = vpop.eup %2303  ;;  %v3211_v61 = vld [vmem:[%s3547_s6] ss:$16 sps:$4 sm:$0xff]  }
 0x5e1   :  { %v1113_v56 = vmul.f32 0.5, %v1112_v45  ;;  %v1117_v1 = vadd.f32 1.0, %v2304_v63  ;;  %v3217_v45 = vld [vmem:[%s3547_s6 + $0x8] ss:$16 sps:$4 sm:$0xff]   ;;  %v3273_v63 = vld [vmem:[%s3547_s6 + $0x64] ss:$16 sps:$4 sm:$0xff]  }
 0x5e2   :  { %v1120_v57 = vmul.f32 %v2302_v47, %v1109_v42  ;;  %v3223_v42 = vld [vmem:[%s3547_s6 + $0x24] ss:$16 sps:$4 sm:$0xff]   ;;  %v3229_v47 = vld [vmem:[%s3547_s6 + $0x2c] ss:$16 sps:$4 sm:$0xff]  }
 0x5e3   :  { %v1119_v59 = vmul.f32 %v1113_v56, %v3105_v46  ;;  %v1118_v2 = vmul.f32 0.5, %v1117_v1  ;;  %v3237_v56 = vld [vmem:[%s3547_s6 + $0x20] ss:$16 sps:$4 sm:$0xff]   ;;  %v3279_v1 = vld [vmem:[%s3547_s6 + $0x6c] ss:$16 sps:$4 sm:$0xff]  }
 0x5e5   :  { %v1121_v9 = vadd.f32 %v1120_v57, %v1119_v59  ;;  %v3243_v57 = vld [vmem:[%s3547_s6 + $0x28] ss:$16 sps:$4 sm:$0xff]   ;;  %v3249_v59 = vld [vmem:[%s3547_s6 + $0x44] ss:$16 sps:$4 sm:$0xff]  }
 0x5e7   :  { %2305 = vtanh.f32 %v1121_v9  ;;  %v3148_v44 = vsel %vm1129_vm13, %v1121_v9, %v3105_v46  ;;  %v3261_v9 = vld [vmem:[%s3547_s6 + $0x40] ss:$16 sps:$4 sm:$0xff]  }
 0x5f1   :  { %v2306_v3 = vpop.eup %2305 }
 0x5f2   :  { %v1123_v4 = vmul.f32 %v2306_v3, %v1118_v2  ;;  %v3285_v2 = vld [vmem:[%s3547_s6 + $0x60] ss:$16 sps:$4 sm:$0xff]   ;;  %v3291_v3 = vld [vmem:[%s3547_s6 + $0x68] ss:$16 sps:$4 sm:$0xff]  }
 0x5f4   :  { %v3151_v5 = vsel %vm1129_vm13, %v1123_v4, %v3108_v60  ;;  %v3297_v4 = vld [vmem:[%s3547_s6 + $0x84] ss:$16 sps:$4 sm:$0xff]  }
 0x5f5   :  { %v1137_v6 = vpack.c.bf16 %v3151_v5, %v3151_v5 }
 0x5f7   :  { %1171 = vmatmul.mubr.bf16.vlgmr.msra.gmra.mrb[16].mxu0 %v1137_v6  ;;  %1212 = vmatmul.mubr.bf16.vlgmr.msra.gmra.mrb[16].mxu1 %v1137_v6  ;;  %v3309_v6 = vld [vmem:[%s3547_s6 + $0x80] ss:$16 sps:$4 sm:$0xff]  }
 0x5f8   :  { %1257 = vmatpush1.bf16.msra.mxu0 %v2763_v53  ;;  %1298 = vmatpush1.bf16.msra.mxu1 %v2788_v20  ;;  %v3190_v53 = vld [vmem:[%s3547_s6 + $0x4] ss:$16 sps:$4 sm:$0xff]   ;;  %v1134_v20 = vld [vmem:[#allocation2 + $0x88] sm:$0xff] }
 0x5f9   :  { %1258 = vmatprep.subr.bf16.mxu0 %v2771_v17  ;;  %1299 = vmatprep.subr.bf16.mxu1 %v2801_v22  ;;  %v3196_v17 = vld [vmem:[%s3547_s6 + $0xc] ss:$16 sps:$4 sm:$0xff]  }
 0x5fa   :  { %1288 = vmatprep.mubr.bf16.mxu0 %v2390_v54  ;;  %1329 = vmatprep.mubr.bf16.mxu1 %v2390_v54 }
 0x5fc   :  { %1259 = vmatpush1.bf16.msra.mxu0 %v2783_v19  ;;  %1300 = vmatpush1.bf16.msra.mxu1 %v2807_v23  ;;  %v1133_v19 = vld [vmem:[#allocation2 + $0x80] sm:$0xff] }
 0x5fd   :  { %1260 = vmatprep.subr.bf16.mxu0 %v2795_v21  ;;  %1301 = vmatprep.subr.bf16.mxu1 %v2825_v26  ;;  %v1135_v26 = vld [vmem:[#allocation2 + $0x90] sm:$0xff] }
 0x600   :  { %1261 = vmatpush1.bf16.msra.mxu0 %v2814_v24  ;;  %1302 = vmatpush1.bf16.msra.mxu1 %v2831_v27 }
 0x601   :  { %1262 = vmatprep.subr.bf16.mxu0 %v2820_v25  ;;  %1303 = vmatprep.subr.bf16.mxu1 %v2843_v29 }
 0x604   :  { %1263 = vmatpush1.bf16.msra.mxu0 %v2838_v28  ;;  %1304 = vmatpush1.bf16.msra.mxu1 %v2860_v32 }
 0x605   :  { %1264 = vmatprep.subr.bf16.mxu0 %v2849_v30  ;;  %1305 = vmatprep.subr.bf16.mxu1 %v2867_v33 }
 0x608   :  { %1265 = vmatpush1.bf16.msra.mxu0 %v2855_v31  ;;  %1306 = vmatpush1.bf16.msra.mxu1 %v2879_v35  ;;  %v1136_v35 = vld [vmem:[#allocation2 + $0x98] sm:$0xff] }
 0x609   :  { %1266 = vmatprep.subr.bf16.mxu0 %v2873_v34  ;;  %1307 = vmatprep.subr.bf16.mxu1 %v2891_v37 }
 0x60c   :  { %1267 = vmatpush1.bf16.msra.mxu0 %v2886_v36  ;;  %1308 = vmatpush1.bf16.msra.mxu1 %v2907_v40 }
 0x60d   :  { %1268 = vmatprep.subr.bf16.mxu0 %v2897_v38  ;;  %1309 = vmatprep.subr.bf16.mxu1 %v2912_v41 }
 0x610   :  { %1269 = vmatpush1.bf16.msra.mxu0 %v2902_v39  ;;  %1310 = vmatpush1.bf16.msra.mxu1 %v2939_v48 }
 0x611   :  { %1270 = vmatprep.subr.bf16.mxu0 %v2923_v43  ;;  %1311 = vmatprep.subr.bf16.mxu1 %v2949_v50 }
 0x614   :  { %1271 = vmatpush1.bf16.msra.mxu0 %v2944_v49  ;;  %1312 = vmatpush1.bf16.msra.mxu1 %v2958_v51 }
 0x615   :  { %1374 = vmatprep.subr.bf16.mxu0 %v3190_v53  ;;  %1415 = vmatprep.subr.bf16.mxu1 %v3196_v17 }
 0x6ca   :  { %v1172_v21 = vpop.f32.mrb[16].mxu0  ;;  %v1213_v22 = vpop.f32.mrb[16].mxu1 }
 0x6cb   :  { %v1220_v23 = vadd.f32 %v1172_v21, %v1133_v19  ;;  %v1174_v24 = vpop.f32.mrb[17].mxu0  ;;  %v1215_v25 = vpop.f32.mrb[17].mxu1  ;;  %v1222_v34 = vadd.f32 %v1213_v22, %v1135_v26  ;;  %v3315_v19 = vld [vmem:[%s3547_s6 + $0x88] ss:$16 sps:$4 sm:$0xff]   ;;  %v3327_v21 = vld [vmem:[%s3547_s6 + $0xac] ss:$16 sps:$4 sm:$0xff]  }
 0x6cc   :  { %v1221_v27 = vadd.f32 %v1174_v24, %v1134_v20  ;;  %v1176_v28 = vpop.f32.mrb[18].mxu0  ;;  %v1217_v29 = vpop.f32.mrb[18].mxu1  ;;  %v1223_v36 = vadd.f32 %v1215_v25, %v1136_v35  ;;  %v3321_v20 = vld [vmem:[%s3547_s6 + $0xa4] ss:$16 sps:$4 sm:$0xff]   ;;  %v3333_v22 = vld [vmem:[%s3547_s6 + $0xa0] ss:$16 sps:$4 sm:$0xff]  }
 0x6cd   :  { %v1224_v30 = vmul.f32 0.5, %v1220_v23  ;;  %v1177_v31 = vpop.f32.mrb[19].mxu0  ;;  %v1218_v32 = vpop.f32.mrb[19].mxu1  ;;  %v3339_v23 = vld [vmem:[%s3547_s6 + $0xa8] ss:$16 sps:$4 sm:$0xff]   ;;  %v1251_v28 = vld [vmem:[#allocation2 + $0xa0] sm:$0xff] }
 0x6ce   :  { %v1228_v33 = vmul.f32 0.5, %v1221_v27  ;;  %v1233_v37 = vmul.f32 0.5, %v1223_v36  ;;  %v3345_v24 = vld [vmem:[%s3547_s6 + $0xc4] ss:$16 sps:$4 sm:$0xff]   ;;  %v3351_v25 = vld [vmem:[%s3547_s6 + $0xcc] ss:$16 sps:$4 sm:$0xff]  }
 0x6cf   :  { %2307 = vtanh.f32 %v1224_v30  ;;  %v3357_v26 = vld [vmem:[%s3547_s6 + $0xc0] ss:$16 sps:$4 sm:$0xff]   ;;  %v3364_v27 = vld [vmem:[%s3547_s6 + $0xe4] ss:$16 sps:$4 sm:$0xff]   ;;  %v1252_v29 = vld [vmem:[#allocation2 + $0xa8] sm:$0xff] }
 0x6d0   :  { %2309 = vtanh.f32 %v1228_v33 }
 0x6d1   :  { %2311 = vtanh.f32 %v1222_v34  ;;  %v1253_v34 = vld [vmem:[#allocation2 + $0xb0] sm:$0xff] }
 0x6d2   :  { %2313 = vtanh.f32 %v1233_v37 }
 0x6d9   :  { %v2308_v38 = vpop.eup %2307 }
 0x6da   :  { %v2310_v39 = vpop.eup %2309  ;;  %v1226_v40 = vadd.f32 1.0, %v2308_v38 }
 0x6db   :  { %v1230_v41 = vadd.f32 1.0, %v2310_v39  ;;  %v2312_v46 = vpop.eup %2311 }
 0x6dc   :  { %v1227_v43 = vmul.f32 0.5, %v1226_v40  ;;  %v2314_v13 = vpop.eup %2313 }
 0x6dd   :  { %v1231_v60 = vmul.f32 0.5, %v1230_v41  ;;  %v1235_v14 = vadd.f32 1.0, %v2314_v13 }
 0x6de   :  { %v1238_v7 = vmul.f32 %v2312_v46, %v1227_v43 }
 0x6df   :  { %v1237_v8 = vmul.f32 %v1231_v60, %v3148_v44  ;;  %v1236_v16 = vmul.f32 0.5, %v1235_v14  ;;  %v1364_v14 = vpop.permute.xlu1 %1363 }
 0x6e0   :  { %vm1365_vm15 = vcmp.eq.s32.totalorder %v1364_v14, 1  ;;  %v2253_v14 = vld [vmem:[%s3548_s8 + $0x28] sm:$0xff]  }
 0x6e1   :  { %v1239_v11 = vadd.f32 %v1238_v7, %v1237_v8 }
 0x6e3   :  { %2315 = vtanh.f32 %v1239_v11  ;;  %v3201_v12 = vsel %vm1247_vm14, %v1239_v11, %v3148_v44  ;;  %v3267_v44 = vld [vmem:[%s3547_s6 + $0x48] ss:$16 sps:$4 sm:$0xff]  }
 0x6ed   :  { %v2316_v18 = vpop.eup %2315 }
 0x6ee   :  { %v1241_v15 = vmul.f32 %v2316_v18, %v1236_v16 }
 0x6f0   :  { %v3204_v52 = vsel %vm1247_vm14, %v1241_v15, %v3151_v5  ;;  %v3303_v5 = vld [vmem:[%s3547_s6 + $0x8c] ss:$16 sps:$4 sm:$0xff]  }
 0x6f1   :  { %v1255_v58 = vpack.c.bf16 %v3204_v52, %v3204_v52 }
 0x6f3   :  { %1289 = vmatmul.mubr.bf16.vlgmr.msra.gmra.mrb[20].mxu0 %v1255_v58  ;;  %1330 = vmatmul.mubr.bf16.vlgmr.msra.gmra.mrb[20].mxu1 %v1255_v58 }
 0x6f4   :  { %1375 = vmatpush1.bf16.msra.mxu0 %v3211_v61  ;;  %1416 = vmatpush1.bf16.msra.mxu1 %v3217_v45 }
 0x6f5   :  { %1376 = vmatprep.subr.bf16.mxu0 %v3223_v42  ;;  %1417 = vmatprep.subr.bf16.mxu1 %v3229_v47 }
 0x6f6   :  { %1406 = vmatprep.mubr.bf16.mxu0 %v2390_v54  ;;  %1447 = vmatprep.mubr.bf16.mxu1 %v2390_v54 }
 0x6f8   :  { %1377 = vmatpush1.bf16.msra.mxu0 %v3237_v56  ;;  %1418 = vmatpush1.bf16.msra.mxu1 %v3243_v57 }
 0x6f9   :  { %1378 = vmatprep.subr.bf16.mxu0 %v3249_v59  ;;  %1419 = vmatprep.subr.bf16.mxu1 %v3255_v62 }
 0x6fc   :  { %1379 = vmatpush1.bf16.msra.mxu0 %v3261_v9  ;;  %1420 = vmatpush1.bf16.msra.mxu1 %v3267_v44 }
 0x6fd   :  { %1380 = vmatprep.subr.bf16.mxu0 %v3273_v63  ;;  %1421 = vmatprep.subr.bf16.mxu1 %v3279_v1 }
 0x700   :  { %1381 = vmatpush1.bf16.msra.mxu0 %v3285_v2  ;;  %1422 = vmatpush1.bf16.msra.mxu1 %v3291_v3 }
 0x701   :  { %1382 = vmatprep.subr.bf16.mxu0 %v3297_v4  ;;  %1423 = vmatprep.subr.bf16.mxu1 %v3303_v5 }
 0x704   :  { %1383 = vmatpush1.bf16.msra.mxu0 %v3309_v6  ;;  %1424 = vmatpush1.bf16.msra.mxu1 %v3315_v19 }
 0x705   :  { %1384 = vmatprep.subr.bf16.mxu0 %v3321_v20  ;;  %1425 = vmatprep.subr.bf16.mxu1 %v3327_v21 }
 0x708   :  { %1385 = vmatpush1.bf16.msra.mxu0 %v3333_v22  ;;  %1426 = vmatpush1.bf16.msra.mxu1 %v3339_v23 }
 0x709   :  { %1386 = vmatprep.subr.bf16.mxu0 %v3345_v24  ;;  %1427 = vmatprep.subr.bf16.mxu1 %v3351_v25 }
 0x70c   :  { %1387 = vmatpush1.bf16.msra.mxu0 %v3357_v26  ;;  %1428 = vmatpush1.bf16.msra.mxu1 %v2939_v48 }
 0x70d   :  { %1388 = vmatprep.subr.bf16.mxu0 %v3364_v27  ;;  %1429 = vmatprep.subr.bf16.mxu1 %v2949_v50 }
 0x710   :  { %1389 = vmatpush1.bf16.msra.mxu0 %v2944_v49  ;;  %1430 = vmatpush1.bf16.msra.mxu1 %v2958_v51 }
 0x711   :  { %1492 = vmatprep.subr.bf16.mxu0 %v3190_v53  ;;  %1533 = vmatprep.subr.bf16.mxu1 %v3196_v17  ;;  %v1254_v53 = vld [vmem:[#allocation2 + $0xb8] sm:$0xff] }
 0x7c6   :  { %v1290_v48 = vpop.f32.mrb[20].mxu0  ;;  %v1331_v30 = vpop.f32.mrb[20].mxu1 }
 0x7c7   :  { %v1338_v31 = vadd.f32 %v1290_v48, %v1251_v28  ;;  %v1292_v32 = vpop.f32.mrb[21].mxu0  ;;  %v1333_v33 = vpop.f32.mrb[21].mxu1  ;;  %v1340_v51 = vadd.f32 %v1331_v30, %v1253_v34 }
 0x7c8   :  { %v1339_v35 = vadd.f32 %v1292_v32, %v1252_v29  ;;  %v1294_v36 = vpop.f32.mrb[22].mxu0  ;;  %v1335_v37 = vpop.f32.mrb[22].mxu1  ;;  %v1341_v17 = vadd.f32 %v1333_v33, %v1254_v53 }
 0x7c9   :  { %v1342_v50 = vmul.f32 0.5, %v1338_v31  ;;  %v1295_v38 = vpop.f32.mrb[23].mxu0  ;;  %v1336_v49 = vpop.f32.mrb[23].mxu1 }
 0x7ca   :  { %v1346_v39 = vmul.f32 0.5, %v1339_v35  ;;  %v1351_v40 = vmul.f32 0.5, %v1341_v17  ;;  %v1482_v34 = vpop.permute.xlu0 %1481 }
 0x7cb   :  { %2317 = vtanh.f32 %v1342_v50  ;;  %vm1483_vm1 = vcmp.eq.s32.totalorder %v1482_v34, 1 }
 0x7cc   :  { %2319 = vtanh.f32 %v1346_v39 }
 0x7cd   :  { %2321 = vtanh.f32 %v1340_v51 }
 0x7ce   :  { %2323 = vtanh.f32 %v1351_v40  ;;  %v2243_v40 = vld [vmem:[%s3548_s8] sm:$0xff]  }
 0x7d5   :  { %v2318_v41 = vpop.eup %2317 }
 0x7d6   :  { %v2320_v43 = vpop.eup %2319  ;;  %v1344_v46 = vadd.f32 1.0, %v2318_v41  ;;  %v2244_v41 = vld [vmem:[%s3549_s9] sm:$0xff]  }
 0x7d7   :  { %v1348_v60 = vadd.f32 1.0, %v2320_v43  ;;  %v2322_v8 = vpop.eup %2321  ;;  %v2245_v43 = vld [vmem:[%s3548_s8 + $0x8] sm:$0xff]  }
 0x7d8   :  { %v1345_v7 = vmul.f32 0.5, %v1344_v46  ;;  %v2324_v15 = vpop.eup %2323  ;;  %v2246_v46 = vld [vmem:[%s3549_s9 + $0x8] sm:$0xff]  }
 0x7d9   :  { %v1349_v10 = vmul.f32 0.5, %v1348_v60  ;;  %v1353_v58 = vadd.f32 1.0, %v2324_v15  ;;  %v2247_v60 = vld [vmem:[%s3548_s8 + $0x10] sm:$0xff]  }
 0x7da   :  { %v1356_v11 = vmul.f32 %v2322_v8, %v1345_v7  ;;  %v2248_v7 = vld [vmem:[%s3549_s9 + $0x10] sm:$0xff]   ;;  %v2249_v8 = vld [vmem:[%s3548_s8 + $0x18] sm:$0xff]  }
 0x7db   :  { %v1355_v13 = vmul.f32 %v1349_v10, %v3201_v12  ;;  %v1354_v28 = vmul.f32 0.5, %v1353_v58  ;;  %v2250_v10 = vld [vmem:[%s3549_s9 + $0x18] sm:$0xff]   ;;  %v2256_v15 = vld [vmem:[%s3549_s9 + $0x30] sm:$0xff]  }
 0x7dc   :  { %v2257_v58 = vld [vmem:[%s3548_s8 + $0x38] sm:$0xff]  }
 0x7dd   :  { %v1357_v16 = vadd.f32 %v1356_v11, %v1355_v13  ;;  %v2251_v11 = vld [vmem:[%s3548_s8 + $0x20] sm:$0xff]  }
 0x7de   :  { %v2252_v13 = vld [vmem:[%s3549_s9 + $0x20] sm:$0xff]  }
 0x7df   :  { %2325 = vtanh.f32 %v1357_v16  ;;  %v3374_v18 = vsel %vm1365_vm15, %v1357_v16, %v3201_v12  ;;  %v2376_v12 = vld [vmem:[%s3547_s6 + $0xec] ss:$16 sps:$4 sm:$0xff]  }
 0x7e0   :  { %v2254_v16 = vld [vmem:[%s3549_s9 + $0x28] sm:$0xff]  }
 0x7e9   :  { %v2326_v29 = vpop.eup %2325 }
 0x7ea   :  { %v1359_v48 = vmul.f32 %v2326_v29, %v1354_v28  ;;  %v2258_v28 = vld [vmem:[%s3549_s9 + $0x38] sm:$0xff]   ;;  %v1603_v29 = vpack.c.bf16 %v2672_v55, %v2672_v55 }
 0x7ec   :  { %v3377_v30 = vsel %vm1365_vm15, %v1359_v48, %v3204_v52  ;;  %v2377_v52 = vld [vmem:[%s3547_s6 + $0xe0] ss:$16 sps:$4 sm:$0xff]  }
 0x7ed   :  { %v1373_v31 = vpack.c.bf16 %v3377_v30, %v3377_v30  ;;  %v1487_v48 = vld [vmem:[#allocation2 + $0xe0] sm:$0xff] }
 0x7ef   :  { %1407 = vmatmul.mubr.bf16.vlgmr.msra.gmra.mrb[24].mxu0 %v1373_v31  ;;  %1448 = vmatmul.mubr.bf16.vlgmr.msra.gmra.mrb[24].mxu1 %v1373_v31 }
 0x7f0   :  { %1493 = vmatpush1.bf16.msra.mxu0 %v3211_v61  ;;  %1534 = vmatpush1.bf16.msra.mxu1 %v3217_v45  ;;  %v2378_v61 = vld [vmem:[%s3547_s6 + $0xe8] ss:$16 sps:$4 sm:$0xff]   ;;  %v1369_v45 = vld [vmem:[#allocation2 + $0xc0] sm:$0xff] }
 0x7f1   :  { %1494 = vmatprep.subr.bf16.mxu0 %v3223_v42  ;;  %1535 = vmatprep.subr.bf16.mxu1 %v3229_v47  ;;  %v1370_v42 = vld [vmem:[#allocation2 + $0xc8] sm:$0xff] }
 0x7f2   :  { %1524 = vmatprep.mubr.bf16.mxu0 %v2390_v54  ;;  %1565 = vmatprep.mubr.bf16.mxu1 %v2390_v54  ;;  %v2375_v54 = vld [vmem:[%s3547_s6 + $0xc8] ss:$16 sps:$4 sm:$0xff]  }
 0x7f4   :  { %1495 = vmatpush1.bf16.msra.mxu0 %v3237_v56  ;;  %1536 = vmatpush1.bf16.msra.mxu1 %v3243_v57 }
 0x7f5   :  { %1496 = vmatprep.subr.bf16.mxu0 %v3249_v59  ;;  %1537 = vmatprep.subr.bf16.mxu1 %v3255_v62 }
 0x7f8   :  { %1497 = vmatpush1.bf16.msra.mxu0 %v3261_v9  ;;  %1538 = vmatpush1.bf16.msra.mxu1 %v3267_v44  ;;  %v1371_v9 = vld [vmem:[#allocation2 + $0xd0] sm:$0xff] }
 0x7f9   :  { %1498 = vmatprep.subr.bf16.mxu0 %v3273_v63  ;;  %1539 = vmatprep.subr.bf16.mxu1 %v3279_v1 }
 0x7fc   :  { %1499 = vmatpush1.bf16.msra.mxu0 %v3285_v2  ;;  %1540 = vmatpush1.bf16.msra.mxu1 %v3291_v3 }
 0x7fd   :  { %1500 = vmatprep.subr.bf16.mxu0 %v3297_v4  ;;  %1541 = vmatprep.subr.bf16.mxu1 %v3303_v5 }
 0x800   :  { %1501 = vmatpush1.bf16.msra.mxu0 %v3309_v6  ;;  %1542 = vmatpush1.bf16.msra.mxu1 %v3315_v19  ;;  %v1372_v19 = vld [vmem:[#allocation2 + $0xd8] sm:$0xff] }
 0x801   :  { %1502 = vmatprep.subr.bf16.mxu0 %v3321_v20  ;;  %1543 = vmatprep.subr.bf16.mxu1 %v3327_v21 }
 0x804   :  { %1503 = vmatpush1.bf16.msra.mxu0 %v3333_v22  ;;  %1544 = vmatpush1.bf16.msra.mxu1 %v3339_v23 }
 0x805   :  { %1504 = vmatprep.subr.bf16.mxu0 %v3345_v24  ;;  %1545 = vmatprep.subr.bf16.mxu1 %v3351_v25 }
 0x808   :  { %1505 = vmatpush1.bf16.msra.mxu0 %v3357_v26  ;;  %1546 = vmatpush1.bf16.msra.mxu1 %v2375_v54 }
 0x809   :  { %1506 = vmatprep.subr.bf16.mxu0 %v3364_v27  ;;  %1547 = vmatprep.subr.bf16.mxu1 %v2376_v12 }
 0x80c   :  { %1507 = vmatpush1.bf16.msra.mxu0 %v2377_v52  ;;  %1548 = vmatpush1.bf16.msra.mxu1 %v2378_v61 }
 0x80d   :  { %2133 = vmatprep.subr.bf16.mxu1 %v2387_v0  ;;  %2113 = vmatprep.subr.bf16.mxu0 %v2387_v0 }
 0x8c2   :  { %v1408_v47 = vpop.f32.mrb[24].mxu0  ;;  %v1449_v56 = vpop.f32.mrb[24].mxu1 }
 0x8c3   :  { %v1456_v57 = vadd.f32 %v1408_v47, %v1369_v45  ;;  %v1410_v59 = vpop.f32.mrb[25].mxu0  ;;  %v1451_v62 = vpop.f32.mrb[25].mxu1  ;;  %v1458_v6 = vadd.f32 %v1449_v56, %v1371_v9  ;;  %v1489_v45 = vld [vmem:[#allocation2 + $0xf0] sm:$0xff] }
 0x8c4   :  { %v1457_v44 = vadd.f32 %v1410_v59, %v1370_v42  ;;  %v1412_v63 = vpop.f32.mrb[26].mxu0  ;;  %v1453_v1 = vpop.f32.mrb[26].mxu1  ;;  %v1459_v20 = vadd.f32 %v1451_v62, %v1372_v19 }
 0x8c5   :  { %v1460_v2 = vmul.f32 0.5, %v1456_v57  ;;  %v1413_v3 = vpop.f32.mrb[27].mxu0  ;;  %v1454_v4 = vpop.f32.mrb[27].mxu1 }
 0x8c6   :  { %v1464_v5 = vmul.f32 0.5, %v1457_v44  ;;  %v1469_v21 = vmul.f32 0.5, %v1459_v20  ;;  %v1490_v44 = vld [vmem:[#allocation2 + $0xf8] sm:$0xff] }
 0x8c7   :  { %2327 = vtanh.f32 %v1460_v2 }
 0x8c8   :  { %2329 = vtanh.f32 %v1464_v5 }
 0x8c9   :  { %2331 = vtanh.f32 %v1458_v6 }
 0x8ca   :  { %2333 = vtanh.f32 %v1469_v21 }
 0x8d1   :  { %v2328_v22 = vpop.eup %2327 }
 0x8d2   :  { %v2330_v23 = vpop.eup %2329  ;;  %v1462_v24 = vadd.f32 1.0, %v2328_v22 }
 0x8d3   :  { %v1466_v25 = vadd.f32 1.0, %v2330_v23  ;;  %v2332_v27 = vpop.eup %2331 }
 0x8d4   :  { %v1463_v26 = vmul.f32 0.5, %v1462_v24  ;;  %v2334_v50 = vpop.eup %2333 }
 0x8d5   :  { %v1467_v32 = vmul.f32 0.5, %v1466_v25  ;;  %v1471_v38 = vadd.f32 1.0, %v2334_v50  ;;  %v2261_v50 = vld [vmem:[%s3551_s11 + $0x10] sm:$0xff]  }
 0x8d6   :  { %v1474_v33 = vmul.f32 %v2332_v27, %v1463_v26  ;;  %v1600_v26 = vpop.permute.xlu1 %1599 }
 0x8d7   :  { %v1473_v35 = vmul.f32 %v1467_v32, %v3374_v18  ;;  %v1472_v49 = vmul.f32 0.5, %v1471_v38  ;;  %vm1601_vm2 = vcmp.eq.s32.totalorder %v1600_v26, 1  ;;  %v2262_v38 = vld [vmem:[%s3551_s11 + $0x18] sm:$0xff]  }
 0x8d9   :  { %v1475_v36 = vadd.f32 %v1474_v33, %v1473_v35  ;;  %v2259_v35 = vld [vmem:[%s3551_s11] sm:$0xff]  }
 0x8db   :  { %2335 = vtanh.f32 %v1475_v36  ;;  %v3425_v37 = vsel %vm1483_vm1, %v1475_v36, %v3374_v18  ;;  %v2255_v18 = vld [vmem:[%s3548_s8 + $0x30] sm:$0xff]  }
 0x8e5   :  { %v2336_v39 = vpop.eup %2335 }
 0x8e6   :  { %v1477_v51 = vmul.f32 %v2336_v39, %v1472_v49  ;;  %v2263_v49 = vld [vmem:[%s3551_s11 + $0x20] sm:$0xff]   ;;  %v2264_v39 = vld [vmem:[%s3551_s11 + $0x28] sm:$0xff]  }
 0x8e8   :  { %v3428_v53 = vsel %vm1483_vm1, %v1477_v51, %v3377_v30  ;;  %v1488_v30 = vld [vmem:[#allocation2 + $0xe8] sm:$0xff] }
 0x8e9   :  { %v1491_v17 = vpack.c.bf16 %v3428_v53, %v3428_v53 }
 0x8eb   :  { %1525 = vmatmul.mubr.bf16.vlgmr.msra.gmra.mrb[28].mxu0 %v1491_v17  ;;  %1566 = vmatmul.mubr.bf16.vlgmr.msra.gmra.mrb[28].mxu1 %v1491_v17 }
 0x8ec   :  { %2149 = vmatprep.mubr.msk.bf16.mxu1 %vm2388_vm0, %v2387_v0  ;;  %2129 = vmatprep.mubr.msk.bf16.mxu0 %vm2388_vm0, %v2387_v0 }
 0x8ed   :  { %2134 = vmatpush3.bf16.msra.mxu1 %v2243_v40  ;;  %2114 = vmatpush3.bf16.msra.mxu0 %v2244_v41  ;;  %v2265_v41 = vld [vmem:[%s3551_s11 + $0x30] sm:$0xff]  }
 0x8ee   :  { %2135 = vmatprep.subr.bf16.mxu1 %v2387_v0  ;;  %2115 = vmatprep.subr.bf16.mxu0 %v2387_v0 }
 0x8f1   :  { %2136 = vmatpush3.bf16.msra.mxu1 %v2245_v43  ;;  %2116 = vmatpush3.bf16.msra.mxu0 %v2246_v46  ;;  %v2266_v43 = vld [vmem:[%s3551_s11 + $0x38] sm:$0xff]  }
 0x8f2   :  { %2137 = vmatprep.subr.bf16.mxu1 %v2387_v0  ;;  %2117 = vmatprep.subr.bf16.mxu0 %v2387_v0 }
 0x8f5   :  { %2138 = vmatpush3.bf16.msra.mxu1 %v2247_v60  ;;  %2118 = vmatpush3.bf16.msra.mxu0 %v2248_v7  ;;  %v2046_v60 = vld [vmem:[%s3550_s10] ss:$0 sm:$0xff] }
 0x8f6   :  { %2139 = vmatprep.subr.bf16.mxu1 %v2387_v0  ;;  %2119 = vmatprep.subr.bf16.mxu0 %v2387_v0 }
 0x8f9   :  { %2140 = vmatpush3.bf16.msra.mxu1 %v2249_v8  ;;  %2120 = vmatpush3.bf16.msra.mxu0 %v2250_v10 }
 0x8fa   :  { %2141 = vmatprep.subr.bf16.mxu1 %v2387_v0  ;;  %2121 = vmatprep.subr.bf16.mxu0 %v2387_v0 }
 0x8fd   :  { %2142 = vmatpush3.bf16.msra.mxu1 %v2251_v11  ;;  %2122 = vmatpush3.bf16.msra.mxu0 %v2252_v13 }
 0x8fe   :  { %2143 = vmatprep.subr.bf16.mxu1 %v2387_v0  ;;  %2123 = vmatprep.subr.bf16.mxu0 %v2387_v0 }
 0x901   :  { %2144 = vmatpush3.bf16.msra.mxu1 %v2253_v14  ;;  %2124 = vmatpush3.bf16.msra.mxu0 %v2254_v16 }
 0x902   :  { %2145 = vmatprep.subr.bf16.mxu1 %v2387_v0  ;;  %2125 = vmatprep.subr.bf16.mxu0 %v2387_v0 }
 0x905   :  { %2146 = vmatpush3.bf16.msra.mxu1 %v2255_v18  ;;  %2126 = vmatpush3.bf16.msra.mxu0 %v2256_v15 }
 0x906   :  { %2147 = vmatprep.subr.bf16.mxu1 %v2387_v0  ;;  %2127 = vmatprep.subr.bf16.mxu0 %v2387_v0 }
 0x909   :  { %2148 = vmatpush3.bf16.msra.mxu1 %v2257_v58  ;;  %2128 = vmatpush3.bf16.msra.mxu0 %v2258_v28 }
 0x90a   :  { %2153 = vmatprep.subr.bf16.mxu0 %v2387_v0 }
 0x90c   :  { %2150 = vmatmul.mubr.bf16.vlgmr.msra.gmra.mrb[32].mxu1 %v1603_v29 }
 0x9be   :  { %v1526_v31 = vpop.f32.mrb[28].mxu0  ;;  %v1567_v54 = vpop.f32.mrb[28].mxu1 }
 0x9bf   :  { %v1574_v12 = vadd.f32 %v1526_v31, %v1487_v48  ;;  %v1528_v52 = vpop.f32.mrb[29].mxu0  ;;  %v1569_v61 = vpop.f32.mrb[29].mxu1  ;;  %v1576_v55 = vadd.f32 %v1567_v54, %v1489_v45 }
 0x9c0   :  { %v1575_v42 = vadd.f32 %v1528_v52, %v1488_v30  ;;  %v1530_v47 = vpop.f32.mrb[30].mxu0  ;;  %v1571_v56 = vpop.f32.mrb[30].mxu1  ;;  %v1577_v63 = vadd.f32 %v1569_v61, %v1490_v44 }
 0x9c1   :  { %v1578_v57 = vmul.f32 0.5, %v1574_v12  ;;  %v1531_v59 = vpop.f32.mrb[31].mxu0  ;;  %v1572_v62 = vpop.f32.mrb[31].mxu1 }
 0x9c2   :  { %v1582_v9 = vmul.f32 0.5, %v1575_v42  ;;  %v1587_v1 = vmul.f32 0.5, %v1577_v63 }
 0x9c3   :  { %2337 = vtanh.f32 %v1578_v57 }
 0x9c4   :  { %2339 = vtanh.f32 %v1582_v9 }
 0x9c5   :  { %2341 = vtanh.f32 %v1576_v55 }
 0x9c6   :  { %2343 = vtanh.f32 %v1587_v1 }
 0x9cd   :  { %v2338_v2 = vpop.eup %2337 }
 0x9ce   :  { %v2340_v3 = vpop.eup %2339  ;;  %v1580_v4 = vadd.f32 1.0, %v2338_v2 }
 0x9cf   :  { %v1584_v5 = vadd.f32 1.0, %v2340_v3  ;;  %v2342_v19 = vpop.eup %2341 }
 0x9d0   :  { %v1581_v6 = vmul.f32 0.5, %v1580_v4  ;;  %v2344_v24 = vpop.eup %2343 }
 0x9d1   :  { %v1585_v20 = vmul.f32 0.5, %v1584_v5  ;;  %v1589_v25 = vadd.f32 1.0, %v2344_v24 }
 0x9d2   :  { %v1592_v21 = vmul.f32 %v2342_v19, %v1581_v6 }
 0x9d3   :  { %v1591_v22 = vmul.f32 %v1585_v20, %v3425_v37  ;;  %v1590_v27 = vmul.f32 0.5, %v1589_v25  ;;  %v2260_v37 = vld [vmem:[%s3551_s11 + $0x8] sm:$0xff]  }
 0x9d5   :  { %v1593_v23 = vadd.f32 %v1592_v21, %v1591_v22 }
 0x9d7   :  { %2345 = vtanh.f32 %v1593_v23 }
 0x9df   :  { %v1807_v51 = vpop.f32.mrb[32].mxu1 }
 0x9e1   :  { %v2346_v32 = vpop.eup %2345 }
 0x9e2   :  { %v1595_v33 = vmul.f32 %v2346_v32, %v1590_v27 }
 0x9e4   :  { %v1602_v34 = vsel %vm1601_vm2, %v1595_v33, %v3428_v53  ;;  %v2151_v53 = vpop.f32.mrb[33].mxu1 }
 0x9e5   :  { %v1620_v36 = vpack.c.bf16 %v1602_v34, %v1602_v34  ;;  %v1810_v17 = vpop.f32.mrb[34].mxu1 }
 0x9e6   :  { %v2152_v40 = vpop.f32.mrb[35].mxu1 }
 0x9e7   :  { %2130 = vmatmul.mubr.bf16.vlgmr.msra.gmra.mrb[32].mxu0 %v1620_v36 }
 0x9e8   :  { %2154 = vmatpush3.bf16.msra.mxu0 %v2259_v35  ;;  %2169 = vmatprep.mubr.msk.bf16.mxu0 %vm2388_vm0, %v2387_v0 }
 0x9e9   :  { %2155 = vmatprep.subr.bf16.mxu0 %v2387_v0 }
 0x9ec   :  { %2156 = vmatpush3.bf16.msra.mxu0 %v2260_v37 }
 0x9ed   :  { %2157 = vmatprep.subr.bf16.mxu0 %v2387_v0 }
 0x9f0   :  { %2158 = vmatpush3.bf16.msra.mxu0 %v2261_v50 }
 0x9f1   :  { %2159 = vmatprep.subr.bf16.mxu0 %v2387_v0 }
 0x9f4   :  { %2160 = vmatpush3.bf16.msra.mxu0 %v2262_v38 }
 0x9f5   :  { %2161 = vmatprep.subr.bf16.mxu0 %v2387_v0 }
 0x9f8   :  { %2162 = vmatpush3.bf16.msra.mxu0 %v2263_v49 }
 0x9f9   :  { %2163 = vmatprep.subr.bf16.mxu0 %v2387_v0 }
 0x9fc   :  { %2164 = vmatpush3.bf16.msra.mxu0 %v2264_v39 }
 0x9fd   :  { %2165 = vmatprep.subr.bf16.mxu0 %v2387_v0 }
 0xa00   :  { %2166 = vmatpush3.bf16.msra.mxu0 %v2265_v41 }
 0xa01   :  { %2167 = vmatprep.subr.bf16.mxu0 %v2387_v0  ;;  %v2047_v0 = vld [vmem:[%s3552_s12] ss:$0 sm:$0xff] }
 0xa04   :  { %2168 = vmatpush3.bf16.msra.mxu0 %v2266_v43 }
 0xaba   :  { %v1719_v46 = vpop.f32.mrb[32].mxu0 }
 0xabb   :  { %v1808_v7 = vadd.f32 %v1807_v51, %v1719_v46  ;;  %v2131_v8 = vpop.f32.mrb[33].mxu0 }
 0xabc   :  { %v1722_v10 = vpop.f32.mrb[34].mxu0 }
 0xabd   :  { %v1820_v11 = vadd.f32 %v2046_v60, %v1808_v7  ;;  %v2132_v13 = vpop.f32.mrb[35].mxu0 }
 0xabf   :  { %v1821_v14 = vmax.f32 %v1820_v11, 0.0 }
 0xac1   :  { %v1822_v16 = vpack.c.bf16 %v1821_v14, %v1821_v14 }
 0xac3   :  { %2170 = vmatmul.mubr.bf16.vlgmr.msra.gmra.mrb[36].mxu0 %v1822_v16 }
 0xb96   :  { %v1928_v18 = vpop.f32.mrb[36].mxu0 }
 0xb97   :  { %v1929_v15 = vadd.f32 %v2047_v0, %v1928_v18  ;;  %v2171_v58 = vpop.f32.mrb[37].mxu0 }
 0xb98   :  { %v1931_v28 = vpop.f32.mrb[38].mxu0 }
 0xb99   :  { %1934 = vst [vmem:[%s3553_s13] sm:$0xff] %v1929_v15  ;;  %v2172_v29 = vpop.f32.mrb[39].mxu0 }

</bundles_post_ra>
